<compile_context>
chip_gen: v6e
topology: v6e:2x2x1
jax: 0.10.0
libtpu: 0.0.40
codegen_flags: <defaults>
</compile_context>

<pallas_src>
import functools

import jax
import jax.numpy as jnp
from jax import lax
from jax.experimental import pallas as pl
from jax.experimental.pallas import tpu as pltpu


def _fused_lstm_kernel(x_ref, wih0_ref, b0_ref, wih_rest_ref, whh_ref,
                       b_rest_ref, out_ref,
                       gates_sc, hseq_sc,
                       *, hidden_dim, num_layers, seq_len, batch_pad, unroll):
    """All LSTM layers fused; whole sequence resident in VMEM.

    x_ref:        (T*Bp, D_in)        bf16  flattened time-major input
    wih0_ref:     (D_in, 4H)          bf16  layer-0 input weights (transposed)
    b0_ref:       (1, 4H)             f32   layer-0 fused bias (b_ih + b_hh)
    wih_rest_ref: (max(L-1,1), H, 4H) bf16  input weights, layers 1..L-1
    whh_ref:      (L, H, 4H)          bf16  recurrent weights, all layers
    b_rest_ref:   (max(L-1,1), 1, 4H) f32   fused biases, layers 1..L-1
    out_ref:      (Bp, H)             f32   hn[-1]
    gates_sc:     (T*Bp, 4H)          f32   per-layer precomputed input gates
    hseq_sc:      (T*Bp, H)           bf16  per-layer output hidden sequence
    """
    H = hidden_dim
    Bp = batch_pad
    T = seq_len

    # Layer-0 input projection: one big MXU matmul, hoisted out of the
    # recurrence (both biases fused into b0).
    gates_sc[...] = (
        jnp.dot(x_ref[...], wih0_ref[...], preferred_element_type=jnp.float32)
        + b0_ref[...])

    for layer in range(num_layers):                       # static, small
        if layer > 0:
            # Input projection for this layer against the previous layer's
            # full hidden sequence (already bf16 -> no whole-sequence cast).
            gates_sc[...] = (
                jnp.dot(hseq_sc[...], wih_rest_ref[layer - 1],
                        preferred_element_type=jnp.float32)
                + b_rest_ref[layer - 1])

        # Recurrent weight hoisted into vregs (fine at H=32; at large H read
        # from the ref inside the loop or keep it MXU-resident with
        # pltpu.matmul_push_rhs / matmul_acc_lhs / matmul_pop).
        w_hh_l = whh_ref[layer]                           # (H, 4H) bf16
        write_seq = (layer + 1 < num_layers)              # last layer: no y_t

        h0 = jnp.zeros((Bp, H), jnp.float32)
        carry0 = (h0.astype(jnp.bfloat16), h0, jnp.zeros((Bp, H), jnp.float32))

        def step(t, carry, w_hh_l=w_hh_l, write_seq=write_seq):
            h_bf, _, c = carry
            row = pl.multiple_of(t * Bp, 8)
            # Serial critical path: one small bf16 MXU matmul + f32 add
            # against the precomputed gate row.
            g = gates_sc[pl.ds(row, Bp), :] + jnp.dot(
                h_bf, w_hh_l, preferred_element_type=jnp.float32)
            # Two EUP passes over the full (Bp, 4H) vreg, then quarter-slice
            # (PyTorch gate order i, f, g, o), instead of 4 32-lane passes.
            sig = jax.nn.sigmoid(g)
            th = jnp.tanh(g)
            i_g = sig[:, 0 * H:1 * H]
            f_g = sig[:, 1 * H:2 * H]
            g_g = th[:, 2 * H:3 * H]
            o_g = sig[:, 3 * H:4 * H]
            c_new = f_g * c + i_g * g_g
            h_new = o_g * jnp.tanh(c_new)
            # bf16 copy produced at the step tail so the pack overlaps with
            # this step's epilogue instead of delaying the next matmul.
            h_bf_new = h_new.astype(jnp.bfloat16)
            if write_seq:
                hseq_sc[pl.ds(row, Bp), :] = h_bf_new
            return (h_bf_new, h_new, c_new)

        _, h_last, _ = lax.fori_loop(0, T, step, carry0, unroll=unroll)

        if layer + 1 == num_layers:
            out_ref[...] = h_last


def _vmem_budget_bytes(T, Bp, D_in, H, L):
    """Size the VMEM limit from the real footprint (f32/bf16), with headroom,
    clamped to the smallest per-core physical budget (v7x: 64 MiB)."""
    f32, bf16 = 4, 2
    footprint = (
        T * Bp * D_in * bf16                     # x
        + D_in * 4 * H * bf16                    # w_ih layer 0
        + 4 * H * f32                            # fused bias layer 0
        + max(L - 1, 1) * H * 4 * H * bf16       # w_ih layers 1..L-1
        + L * H * 4 * H * bf16                   # w_hh all layers
        + max(L - 1, 1) * 4 * H * f32            # fused biases 1..L-1
        + Bp * H * f32                           # output
        + T * Bp * 4 * H * f32                   # gates scratch
        + T * Bp * H * bf16)                     # hidden-sequence scratch
    return int(min(max(4 * footprint, 8 << 20), 56 << 20))


def lstm_encoder_forward(x, params, hidden_dim):
    """x: (B, T, input_dim), batch_first like the PyTorch module.
    params: list of (w_ih, w_hh, b_ih, b_hh) per layer (PyTorch shapes).
    Returns hn[-1]: (B, hidden_dim), float32."""
    B, T, D_in = x.shape
    H = hidden_dim
    L = len(params)
    Bp = ((B + 7) // 8) * 8                       # pad batch to 8 sublanes

    # Time-major, batch-padded, flattened so every timestep is a contiguous
    # (Bp, :) sublane block; bf16 for the MXU.  (At these sizes this prep is
    # noise; for real T*B*D fold it into a time-chunked BlockSpec index_map.)
    x_tm = jnp.transpose(x.astype(jnp.float32), (1, 0, 2))        # (T, B, D)
    x_tm = jnp.pad(x_tm, ((0, 0), (0, Bp - B), (0, 0)))
    x_flat = x_tm.reshape(T * Bp, D_in).astype(jnp.bfloat16)

    def prep_w(w):    # (4H, D) -> (D, 4H), bf16 for the MXU
        return jnp.asarray(w, jnp.float32).T.astype(jnp.bfloat16)

    def prep_b(b_ih, b_hh):   # fuse the two biases, keep f32
        return (jnp.asarray(b_ih, jnp.float32)
                + jnp.asarray(b_hh, jnp.float32)).reshape(1, 4 * H)

    w_ih0, _, b_ih0, b_hh0 = params[0]
    wih0_t = prep_w(w_ih0)                                         # (D_in, 4H)
    b0 = prep_b(b_ih0, b_hh0)                                      # (1, 4H)
    whh_all = jnp.stack([prep_w(p[1]) for p in params])            # (L, H, 4H)
    if L > 1:
        wih_rest = jnp.stack([prep_w(p[0]) for p in params[1:]])   # (L-1, H, 4H)
        b_rest = jnp.stack([prep_b(p[2], p[3]) for p in params[1:]])
    else:   # placeholders; never read inside the kernel when L == 1
        wih_rest = jnp.zeros((1, H, 4 * H), jnp.bfloat16)
        b_rest = jnp.zeros((1, 1, 4 * H), jnp.float32)

    unroll = True if T <= 16 else 8               # bounded unroll for long T

    kernel = functools.partial(
        _fused_lstm_kernel, hidden_dim=H, num_layers=L,
        seq_len=T, batch_pad=Bp, unroll=unroll)

    # Whole problem fits in VMEM at these sizes: no grid, full arrays
    # resident, one kernel invocation for all layers and timesteps.
    h_last = pl.pallas_call(
        kernel,
        out_shape=jax.ShapeDtypeStruct((Bp, H), jnp.float32),
        scratch_shapes=[
            pltpu.VMEM((T * Bp, 4 * H), jnp.float32),   # precomputed gates
            pltpu.VMEM((T * Bp, H), jnp.bfloat16),      # layer hidden sequence
        ],
        compiler_params=pltpu.CompilerParams(
            vmem_limit_bytes=_vmem_budget_bytes(T, Bp, D_in, H, L)),
    )(x_flat, wih0_t, b0, wih_rest, whh_all, b_rest)
    return h_last[:B]


def _reference_lstm(x, params, hidden_dim):
    """Pure-JAX f32 reference (PyTorch LSTM semantics, zero initial state)."""
    B, T, _ = x.shape
    H = hidden_dim
    inp = x.astype(jnp.float32)
    h_last = None
    for (w_ih, w_hh, b_ih, b_hh) in params:
        h = jnp.zeros((B, H), jnp.float32)
        c = jnp.zeros((B, H), jnp.float32)
        outs = []
        for t in range(T):
            g = inp[:, t, :] @ w_ih.T + h @ w_hh.T + b_ih + b_hh
            i = jax.nn.sigmoid(g[:, 0 * H:1 * H])
            f = jax.nn.sigmoid(g[:, 1 * H:2 * H])
            gg = jnp.tanh(g[:, 2 * H:3 * H])
            o = jax.nn.sigmoid(g[:, 3 * H:4 * H])
            c = f * c + i * gg
            h = o * jnp.tanh(c)
            outs.append(h)
        inp = jnp.stack(outs, axis=1)
        h_last = h
    return h_last


def init_params(key, input_dim, hidden_dim, num_layers):
    """PyTorch-shaped params per layer: (4H, D_in_l), (4H, H), (4H,), (4H,)
    with U(-1/sqrt(H), 1/sqrt(H))."""
    params = []
    bound = 1.0 / (hidden_dim ** 0.5)
    d_in = input_dim
    for _ in range(num_layers):
        key, k1, k2, k3, k4 = jax.random.split(key, 5)
        w_ih = jax.random.uniform(k1, (4 * hidden_dim, d_in),
                                  jnp.float32, -bound, bound)
        w_hh = jax.random.uniform(k2, (4 * hidden_dim, hidden_dim),
                                  jnp.float32, -bound, bound)
        b_ih = jax.random.uniform(k3, (4 * hidden_dim,),
                                  jnp.float32, -bound, bound)
        b_hh = jax.random.uniform(k4, (4 * hidden_dim,),
                                  jnp.float32, -bound, bound)
        params.append((w_ih, w_hh, b_ih, b_hh))
        d_in = hidden_dim
    return params


if __name__ == "__main__":
    B, T, INPUT_DIM, HIDDEN_DIM, NUM_LAYERS = 2, 8, 16, 32, 2

    root = jax.random.PRNGKey(0)
    k_x, k_p = jax.random.split(root)
    x = jax.random.normal(k_x, (B, T, INPUT_DIM), jnp.float32)
    params = init_params(k_p, INPUT_DIM, HIDDEN_DIM, NUM_LAYERS)

    out = lstm_encoder_forward(x, params, HIDDEN_DIM)   # hn[-1]: (B, HIDDEN_DIM)
    out = jax.block_until_ready(out)

    ref = _reference_lstm(x, params, HIDDEN_DIM)
    assert out.shape == (B, HIDDEN_DIM)
    # bf16 MXU operands (f32 accumulate + f32 element-wise) -> loosened tol.
    max_err = float(jnp.max(jnp.abs(out - ref)))
    assert jnp.allclose(out, ref, atol=5e-2, rtol=5e-2), (
        f"mismatch vs reference: max abs err = {max_err}")

    print("KERNEL_OK")
</pallas_src>

<mosaic_0001>
module attributes {stable_mosaic.version = 11 : i64} {
  func.func @_fused_lstm_kernel(%arg0: memref<64x16xbf16, #tpu.memory_space<vmem>>, %arg1: memref<16x128xbf16, #tpu.memory_space<vmem>>, %arg2: memref<1x128xf32, #tpu.memory_space<vmem>>, %arg3: memref<1x32x128xbf16, #tpu.memory_space<vmem>>, %arg4: memref<2x32x128xbf16, #tpu.memory_space<vmem>>, %arg5: memref<1x1x128xf32, #tpu.memory_space<vmem>>, %arg6: memref<8x32xf32, #tpu.memory_space<vmem>>, %arg7: memref<64x128xf32, #tpu.memory_space<vmem>>, %arg8: memref<64x32xbf16, #tpu.memory_space<vmem>>) attributes {dimension_semantics = [], scalar_prefetch = 0 : i64, scratch_operands = 2 : i64, tpu.core_type = #tpu.core_type<tc>} {
    %c0 = arith.constant 0 : index
    %c0_0 = arith.constant 0 : index
    %0 = vector.load %arg0[%c0, %c0_0] : memref<64x16xbf16, #tpu.memory_space<vmem>>, vector<64x16xbf16>
    %c0_1 = arith.constant 0 : index
    %c0_2 = arith.constant 0 : index
    %1 = vector.load %arg1[%c0_1, %c0_2] : memref<16x128xbf16, #tpu.memory_space<vmem>>, vector<16x128xbf16>
    %cst = arith.constant dense<0.000000e+00> : vector<64x128xf32>
    %2 = tpu.matmul %0, %1, %cst {dimension_numbers = #tpu.dot_dimension_numbers<[1], [0], [0], [1], [0, 0, 1, 1], [], []>} : vector<64x16xbf16>, vector<16x128xbf16>, vector<64x128xf32> -> vector<64x128xf32>
    %c0_3 = arith.constant 0 : index
    %c0_4 = arith.constant 0 : index
    %3 = vector.load %arg2[%c0_3, %c0_4] : memref<1x128xf32, #tpu.memory_space<vmem>>, vector<1x128xf32>
    %4 = vector.broadcast %3 : vector<1x128xf32> to vector<64x128xf32>
    %5 = arith.addf %2, %4 : vector<64x128xf32>
    %c0_5 = arith.constant 0 : index
    %c0_6 = arith.constant 0 : index
    %6 = vector.load %arg7[%c0_5, %c0_6] : memref<64x128xf32, #tpu.memory_space<vmem>>, vector<64x128xf32>
    tpu.vector_store %arg7[%c0_5, %c0_6], %5 {strides = array<i32>} : memref<64x128xf32, #tpu.memory_space<vmem>>, vector<64x128xf32>,
    %c0_7 = arith.constant 0 : index
    %c0_8 = arith.constant 0 : index
    %c0_9 = arith.constant 0 : index
    %7 = vector.load %arg4[%c0_7, %c0_8, %c0_9] : memref<2x32x128xbf16, #tpu.memory_space<vmem>>, vector<1x32x128xbf16>
    %8 = vector.shape_cast %7 : vector<1x32x128xbf16> to vector<32x128xbf16>
    %cst_10 = arith.constant 0.000000e+00 : f32
    %9 = vector.broadcast %cst_10 : f32 to vector<8x32xf32>
    %10 = arith.truncf %9 : vector<8x32xf32> to vector<8x32xbf16>
    %cst_11 = arith.constant 0.000000e+00 : f32
    %11 = vector.broadcast %cst_11 : f32 to vector<8x32xf32>
    %c0_i32 = arith.constant 0 : i32
    %c8_i32 = arith.constant 8 : i32
    %12 = arith.muli %c0_i32, %c8_i32 : i32
    %13 = tpu.assume_multiple %12, 8 : i32
    %14 = arith.index_cast %13 : i32 to index
    %c0_12 = arith.constant 0 : index
    %15 = vector.load %arg7[%14, %c0_12] : memref<64x128xf32, #tpu.memory_space<vmem>>, vector<8x128xf32>
    %cst_13 = arith.constant dense<0.000000e+00> : vector<8x128xf32>
    %16 = tpu.matmul %10, %8, %cst_13 {dimension_numbers = #tpu.dot_dimension_numbers<[1], [0], [0], [1], [0, 0, 1, 1], [], []>} : vector<8x32xbf16>, vector<32x128xbf16>, vector<8x128xf32> -> vector<8x128xf32>
    %17 = arith.addf %15, %16 : vector<8x128xf32>
    %18 = arith.negf %17 : vector<8x128xf32>
    %19 = math.exp %18 : vector<8x128xf32>
    %cst_14 = arith.constant 1.000000e+00 : f32
    %20 = vector.broadcast %cst_14 : f32 to vector<8x128xf32>
    %21 = arith.addf %20, %19 : vector<8x128xf32>
    %22 = arith.divf %20, %21 : vector<8x128xf32>
    %23 = math.tanh %17 : vector<8x128xf32>
    %24 = vector.extract_strided_slice %22 {offsets = [0, 0], sizes = [8, 32], strides = [1, 1]} : vector<8x128xf32> to vector<8x32xf32>
    %25 = vector.extract_strided_slice %22 {offsets = [0, 32], sizes = [8, 32], strides = [1, 1]} : vector<8x128xf32> to vector<8x32xf32>
    %26 = vector.extract_strided_slice %23 {offsets = [0, 64], sizes = [8, 32], strides = [1, 1]} : vector<8x128xf32> to vector<8x32xf32>
    %27 = vector.extract_strided_slice %22 {offsets = [0, 96], sizes = [8, 32], strides = [1, 1]} : vector<8x128xf32> to vector<8x32xf32>
    %28 = arith.mulf %25, %11 : vector<8x32xf32>
    %29 = arith.mulf %24, %26 : vector<8x32xf32>
    %30 = arith.addf %28, %29 : vector<8x32xf32>
    %31 = math.tanh %30 : vector<8x32xf32>
    %32 = arith.mulf %27, %31 : vector<8x32xf32>
    %33 = arith.truncf %32 : vector<8x32xf32> to vector<8x32xbf16>
    %34 = arith.index_cast %13 : i32 to index
    %c0_15 = arith.constant 0 : index
    %35 = vector.load %arg8[%34, %c0_15] : memref<64x32xbf16, #tpu.memory_space<vmem>>, vector<8x32xbf16>
    tpu.vector_store %arg8[%34, %c0_15], %33 {strides = array<i32>} : memref<64x32xbf16, #tpu.memory_space<vmem>>, vector<8x32xbf16>,
    %c1_i32 = arith.constant 1 : i32
    %c8_i32_16 = arith.constant 8 : i32
    %36 = arith.muli %c1_i32, %c8_i32_16 : i32
    %37 = tpu.assume_multiple %36, 8 : i32
    %38 = arith.index_cast %37 : i32 to index
    %c0_17 = arith.constant 0 : index
    %39 = vector.load %arg7[%38, %c0_17] : memref<64x128xf32, #tpu.memory_space<vmem>>, vector<8x128xf32>
    %cst_18 = arith.constant dense<0.000000e+00> : vector<8x128xf32>
    %40 = tpu.matmul %33, %8, %cst_18 {dimension_numbers = #tpu.dot_dimension_numbers<[1], [0], [0], [1], [0, 0, 1, 1], [], []>} : vector<8x32xbf16>, vector<32x128xbf16>, vector<8x128xf32> -> vector<8x128xf32>
    %41 = arith.addf %39, %40 : vector<8x128xf32>
    %42 = arith.negf %41 : vector<8x128xf32>
    %43 = math.exp %42 : vector<8x128xf32>
    %cst_19 = arith.constant 1.000000e+00 : f32
    %44 = vector.broadcast %cst_19 : f32 to vector<8x128xf32>
    %45 = arith.addf %44, %43 : vector<8x128xf32>
    %46 = arith.divf %44, %45 : vector<8x128xf32>
    %47 = math.tanh %41 : vector<8x128xf32>
    %48 = vector.extract_strided_slice %46 {offsets = [0, 0], sizes = [8, 32], strides = [1, 1]} : vector<8x128xf32> to vector<8x32xf32>
    %49 = vector.extract_strided_slice %46 {offsets = [0, 32], sizes = [8, 32], strides = [1, 1]} : vector<8x128xf32> to vector<8x32xf32>
    %50 = vector.extract_strided_slice %47 {offsets = [0, 64], sizes = [8, 32], strides = [1, 1]} : vector<8x128xf32> to vector<8x32xf32>
    %51 = vector.extract_strided_slice %46 {offsets = [0, 96], sizes = [8, 32], strides = [1, 1]} : vector<8x128xf32> to vector<8x32xf32>
    %52 = arith.mulf %49, %30 : vector<8x32xf32>
    %53 = arith.mulf %48, %50 : vector<8x32xf32>
    %54 = arith.addf %52, %53 : vector<8x32xf32>
    %55 = math.tanh %54 : vector<8x32xf32>
    %56 = arith.mulf %51, %55 : vector<8x32xf32>
    %57 = arith.truncf %56 : vector<8x32xf32> to vector<8x32xbf16>
    %58 = arith.index_cast %37 : i32 to index
    %c0_20 = arith.constant 0 : index
    %59 = vector.load %arg8[%58, %c0_20] : memref<64x32xbf16, #tpu.memory_space<vmem>>, vector<8x32xbf16>
    tpu.vector_store %arg8[%58, %c0_20], %57 {strides = array<i32>} : memref<64x32xbf16, #tpu.memory_space<vmem>>, vector<8x32xbf16>,
    %c2_i32 = arith.constant 2 : i32
    %c8_i32_21 = arith.constant 8 : i32
    %60 = arith.muli %c2_i32, %c8_i32_21 : i32
    %61 = tpu.assume_multiple %60, 8 : i32
    %62 = arith.index_cast %61 : i32 to index
    %c0_22 = arith.constant 0 : index
    %63 = vector.load %arg7[%62, %c0_22] : memref<64x128xf32, #tpu.memory_space<vmem>>, vector<8x128xf32>
    %cst_23 = arith.constant dense<0.000000e+00> : vector<8x128xf32>
    %64 = tpu.matmul %57, %8, %cst_23 {dimension_numbers = #tpu.dot_dimension_numbers<[1], [0], [0], [1], [0, 0, 1, 1], [], []>} : vector<8x32xbf16>, vector<32x128xbf16>, vector<8x128xf32> -> vector<8x128xf32>
    %65 = arith.addf %63, %64 : vector<8x128xf32>
    %66 = arith.negf %65 : vector<8x128xf32>
    %67 = math.exp %66 : vector<8x128xf32>
    %cst_24 = arith.constant 1.000000e+00 : f32
    %68 = vector.broadcast %cst_24 : f32 to vector<8x128xf32>
    %69 = arith.addf %68, %67 : vector<8x128xf32>
    %70 = arith.divf %68, %69 : vector<8x128xf32>
    %71 = math.tanh %65 : vector<8x128xf32>
    %72 = vector.extract_strided_slice %70 {offsets = [0, 0], sizes = [8, 32], strides = [1, 1]} : vector<8x128xf32> to vector<8x32xf32>
    %73 = vector.extract_strided_slice %70 {offsets = [0, 32], sizes = [8, 32], strides = [1, 1]} : vector<8x128xf32> to vector<8x32xf32>
    %74 = vector.extract_strided_slice %71 {offsets = [0, 64], sizes = [8, 32], strides = [1, 1]} : vector<8x128xf32> to vector<8x32xf32>
    %75 = vector.extract_strided_slice %70 {offsets = [0, 96], sizes = [8, 32], strides = [1, 1]} : vector<8x128xf32> to vector<8x32xf32>
    %76 = arith.mulf %73, %54 : vector<8x32xf32>
    %77 = arith.mulf %72, %74 : vector<8x32xf32>
    %78 = arith.addf %76, %77 : vector<8x32xf32>
    %79 = math.tanh %78 : vector<8x32xf32>
    %80 = arith.mulf %75, %79 : vector<8x32xf32>
    %81 = arith.truncf %80 : vector<8x32xf32> to vector<8x32xbf16>
    %82 = arith.index_cast %61 : i32 to index
    %c0_25 = arith.constant 0 : index
    %83 = vector.load %arg8[%82, %c0_25] : memref<64x32xbf16, #tpu.memory_space<vmem>>, vector<8x32xbf16>
    tpu.vector_store %arg8[%82, %c0_25], %81 {strides = array<i32>} : memref<64x32xbf16, #tpu.memory_space<vmem>>, vector<8x32xbf16>,
    %c3_i32 = arith.constant 3 : i32
    %c8_i32_26 = arith.constant 8 : i32
    %84 = arith.muli %c3_i32, %c8_i32_26 : i32
    %85 = tpu.assume_multiple %84, 8 : i32
    %86 = arith.index_cast %85 : i32 to index
    %c0_27 = arith.constant 0 : index
    %87 = vector.load %arg7[%86, %c0_27] : memref<64x128xf32, #tpu.memory_space<vmem>>, vector<8x128xf32>
    %cst_28 = arith.constant dense<0.000000e+00> : vector<8x128xf32>
    %88 = tpu.matmul %81, %8, %cst_28 {dimension_numbers = #tpu.dot_dimension_numbers<[1], [0], [0], [1], [0, 0, 1, 1], [], []>} : vector<8x32xbf16>, vector<32x128xbf16>, vector<8x128xf32> -> vector<8x128xf32>
    %89 = arith.addf %87, %88 : vector<8x128xf32>
    %90 = arith.negf %89 : vector<8x128xf32>
    %91 = math.exp %90 : vector<8x128xf32>
    %cst_29 = arith.constant 1.000000e+00 : f32
    %92 = vector.broadcast %cst_29 : f32 to vector<8x128xf32>
    %93 = arith.addf %92, %91 : vector<8x128xf32>
    %94 = arith.divf %92, %93 : vector<8x128xf32>
    %95 = math.tanh %89 : vector<8x128xf32>
    %96 = vector.extract_strided_slice %94 {offsets = [0, 0], sizes = [8, 32], strides = [1, 1]} : vector<8x128xf32> to vector<8x32xf32>
    %97 = vector.extract_strided_slice %94 {offsets = [0, 32], sizes = [8, 32], strides = [1, 1]} : vector<8x128xf32> to vector<8x32xf32>
    %98 = vector.extract_strided_slice %95 {offsets = [0, 64], sizes = [8, 32], strides = [1, 1]} : vector<8x128xf32> to vector<8x32xf32>
    %99 = vector.extract_strided_slice %94 {offsets = [0, 96], sizes = [8, 32], strides = [1, 1]} : vector<8x128xf32> to vector<8x32xf32>
    %100 = arith.mulf %97, %78 : vector<8x32xf32>
    %101 = arith.mulf %96, %98 : vector<8x32xf32>
    %102 = arith.addf %100, %101 : vector<8x32xf32>
    %103 = math.tanh %102 : vector<8x32xf32>
    %104 = arith.mulf %99, %103 : vector<8x32xf32>
    %105 = arith.truncf %104 : vector<8x32xf32> to vector<8x32xbf16>
    %106 = arith.index_cast %85 : i32 to index
    %c0_30 = arith.constant 0 : index
    %107 = vector.load %arg8[%106, %c0_30] : memref<64x32xbf16, #tpu.memory_space<vmem>>, vector<8x32xbf16>
    tpu.vector_store %arg8[%106, %c0_30], %105 {strides = array<i32>} : memref<64x32xbf16, #tpu.memory_space<vmem>>, vector<8x32xbf16>,
    %c4_i32 = arith.constant 4 : i32
    %c8_i32_31 = arith.constant 8 : i32
    %108 = arith.muli %c4_i32, %c8_i32_31 : i32
    %109 = tpu.assume_multiple %108, 8 : i32
    %110 = arith.index_cast %109 : i32 to index
    %c0_32 = arith.constant 0 : index
    %111 = vector.load %arg7[%110, %c0_32] : memref<64x128xf32, #tpu.memory_space<vmem>>, vector<8x128xf32>
    %cst_33 = arith.constant dense<0.000000e+00> : vector<8x128xf32>
    %112 = tpu.matmul %105, %8, %cst_33 {dimension_numbers = #tpu.dot_dimension_numbers<[1], [0], [0], [1], [0, 0, 1, 1], [], []>} : vector<8x32xbf16>, vector<32x128xbf16>, vector<8x128xf32> -> vector<8x128xf32>
    %113 = arith.addf %111, %112 : vector<8x128xf32>
    %114 = arith.negf %113 : vector<8x128xf32>
    %115 = math.exp %114 : vector<8x128xf32>
    %cst_34 = arith.constant 1.000000e+00 : f32
    %116 = vector.broadcast %cst_34 : f32 to vector<8x128xf32>
    %117 = arith.addf %116, %115 : vector<8x128xf32>
    %118 = arith.divf %116, %117 : vector<8x128xf32>
    %119 = math.tanh %113 : vector<8x128xf32>
    %120 = vector.extract_strided_slice %118 {offsets = [0, 0], sizes = [8, 32], strides = [1, 1]} : vector<8x128xf32> to vector<8x32xf32>
    %121 = vector.extract_strided_slice %118 {offsets = [0, 32], sizes = [8, 32], strides = [1, 1]} : vector<8x128xf32> to vector<8x32xf32>
    %122 = vector.extract_strided_slice %119 {offsets = [0, 64], sizes = [8, 32], strides = [1, 1]} : vector<8x128xf32> to vector<8x32xf32>
    %123 = vector.extract_strided_slice %118 {offsets = [0, 96], sizes = [8, 32], strides = [1, 1]} : vector<8x128xf32> to vector<8x32xf32>
    %124 = arith.mulf %121, %102 : vector<8x32xf32>
    %125 = arith.mulf %120, %122 : vector<8x32xf32>
    %126 = arith.addf %124, %125 : vector<8x32xf32>
    %127 = math.tanh %126 : vector<8x32xf32>
    %128 = arith.mulf %123, %127 : vector<8x32xf32>
    %129 = arith.truncf %128 : vector<8x32xf32> to vector<8x32xbf16>
    %130 = arith.index_cast %109 : i32 to index
    %c0_35 = arith.constant 0 : index
    %131 = vector.load %arg8[%130, %c0_35] : memref<64x32xbf16, #tpu.memory_space<vmem>>, vector<8x32xbf16>
    tpu.vector_store %arg8[%130, %c0_35], %129 {strides = array<i32>} : memref<64x32xbf16, #tpu.memory_space<vmem>>, vector<8x32xbf16>,
    %c5_i32 = arith.constant 5 : i32
    %c8_i32_36 = arith.constant 8 : i32
    %132 = arith.muli %c5_i32, %c8_i32_36 : i32
    %133 = tpu.assume_multiple %132, 8 : i32
    %134 = arith.index_cast %133 : i32 to index
    %c0_37 = arith.constant 0 : index
    %135 = vector.load %arg7[%134, %c0_37] : memref<64x128xf32, #tpu.memory_space<vmem>>, vector<8x128xf32>
    %cst_38 = arith.constant dense<0.000000e+00> : vector<8x128xf32>
    %136 = tpu.matmul %129, %8, %cst_38 {dimension_numbers = #tpu.dot_dimension_numbers<[1], [0], [0], [1], [0, 0, 1, 1], [], []>} : vector<8x32xbf16>, vector<32x128xbf16>, vector<8x128xf32> -> vector<8x128xf32>
    %137 = arith.addf %135, %136 : vector<8x128xf32>
    %138 = arith.negf %137 : vector<8x128xf32>
    %139 = math.exp %138 : vector<8x128xf32>
    %cst_39 = arith.constant 1.000000e+00 : f32
    %140 = vector.broadcast %cst_39 : f32 to vector<8x128xf32>
    %141 = arith.addf %140, %139 : vector<8x128xf32>
    %142 = arith.divf %140, %141 : vector<8x128xf32>
    %143 = math.tanh %137 : vector<8x128xf32>
    %144 = vector.extract_strided_slice %142 {offsets = [0, 0], sizes = [8, 32], strides = [1, 1]} : vector<8x128xf32> to vector<8x32xf32>
    %145 = vector.extract_strided_slice %142 {offsets = [0, 32], sizes = [8, 32], strides = [1, 1]} : vector<8x128xf32> to vector<8x32xf32>
    %146 = vector.extract_strided_slice %143 {offsets = [0, 64], sizes = [8, 32], strides = [1, 1]} : vector<8x128xf32> to vector<8x32xf32>
    %147 = vector.extract_strided_slice %142 {offsets = [0, 96], sizes = [8, 32], strides = [1, 1]} : vector<8x128xf32> to vector<8x32xf32>
    %148 = arith.mulf %145, %126 : vector<8x32xf32>
    %149 = arith.mulf %144, %146 : vector<8x32xf32>
    %150 = arith.addf %148, %149 : vector<8x32xf32>
    %151 = math.tanh %150 : vector<8x32xf32>
    %152 = arith.mulf %147, %151 : vector<8x32xf32>
    %153 = arith.truncf %152 : vector<8x32xf32> to vector<8x32xbf16>
    %154 = arith.index_cast %133 : i32 to index
    %c0_40 = arith.constant 0 : index
    %155 = vector.load %arg8[%154, %c0_40] : memref<64x32xbf16, #tpu.memory_space<vmem>>, vector<8x32xbf16>
    tpu.vector_store %arg8[%154, %c0_40], %153 {strides = array<i32>} : memref<64x32xbf16, #tpu.memory_space<vmem>>, vector<8x32xbf16>,
    %c6_i32 = arith.constant 6 : i32
    %c8_i32_41 = arith.constant 8 : i32
    %156 = arith.muli %c6_i32, %c8_i32_41 : i32
    %157 = tpu.assume_multiple %156, 8 : i32
    %158 = arith.index_cast %157 : i32 to index
    %c0_42 = arith.constant 0 : index
    %159 = vector.load %arg7[%158, %c0_42] : memref<64x128xf32, #tpu.memory_space<vmem>>, vector<8x128xf32>
    %cst_43 = arith.constant dense<0.000000e+00> : vector<8x128xf32>
    %160 = tpu.matmul %153, %8, %cst_43 {dimension_numbers = #tpu.dot_dimension_numbers<[1], [0], [0], [1], [0, 0, 1, 1], [], []>} : vector<8x32xbf16>, vector<32x128xbf16>, vector<8x128xf32> -> vector<8x128xf32>
    %161 = arith.addf %159, %160 : vector<8x128xf32>
    %162 = arith.negf %161 : vector<8x128xf32>
    %163 = math.exp %162 : vector<8x128xf32>
    %cst_44 = arith.constant 1.000000e+00 : f32
    %164 = vector.broadcast %cst_44 : f32 to vector<8x128xf32>
    %165 = arith.addf %164, %163 : vector<8x128xf32>
    %166 = arith.divf %164, %165 : vector<8x128xf32>
    %167 = math.tanh %161 : vector<8x128xf32>
    %168 = vector.extract_strided_slice %166 {offsets = [0, 0], sizes = [8, 32], strides = [1, 1]} : vector<8x128xf32> to vector<8x32xf32>
    %169 = vector.extract_strided_slice %166 {offsets = [0, 32], sizes = [8, 32], strides = [1, 1]} : vector<8x128xf32> to vector<8x32xf32>
    %170 = vector.extract_strided_slice %167 {offsets = [0, 64], sizes = [8, 32], strides = [1, 1]} : vector<8x128xf32> to vector<8x32xf32>
    %171 = vector.extract_strided_slice %166 {offsets = [0, 96], sizes = [8, 32], strides = [1, 1]} : vector<8x128xf32> to vector<8x32xf32>
    %172 = arith.mulf %169, %150 : vector<8x32xf32>
    %173 = arith.mulf %168, %170 : vector<8x32xf32>
    %174 = arith.addf %172, %173 : vector<8x32xf32>
    %175 = math.tanh %174 : vector<8x32xf32>
    %176 = arith.mulf %171, %175 : vector<8x32xf32>
    %177 = arith.truncf %176 : vector<8x32xf32> to vector<8x32xbf16>
    %178 = arith.index_cast %157 : i32 to index
    %c0_45 = arith.constant 0 : index
    %179 = vector.load %arg8[%178, %c0_45] : memref<64x32xbf16, #tpu.memory_space<vmem>>, vector<8x32xbf16>
    tpu.vector_store %arg8[%178, %c0_45], %177 {strides = array<i32>} : memref<64x32xbf16, #tpu.memory_space<vmem>>, vector<8x32xbf16>,
    %c7_i32 = arith.constant 7 : i32
    %c8_i32_46 = arith.constant 8 : i32
    %180 = arith.muli %c7_i32, %c8_i32_46 : i32
    %181 = tpu.assume_multiple %180, 8 : i32
    %182 = arith.index_cast %181 : i32 to index
    %c0_47 = arith.constant 0 : index
    %183 = vector.load %arg7[%182, %c0_47] : memref<64x128xf32, #tpu.memory_space<vmem>>, vector<8x128xf32>
    %cst_48 = arith.constant dense<0.000000e+00> : vector<8x128xf32>
    %184 = tpu.matmul %177, %8, %cst_48 {dimension_numbers = #tpu.dot_dimension_numbers<[1], [0], [0], [1], [0, 0, 1, 1], [], []>} : vector<8x32xbf16>, vector<32x128xbf16>, vector<8x128xf32> -> vector<8x128xf32>
    %185 = arith.addf %183, %184 : vector<8x128xf32>
    %186 = arith.negf %185 : vector<8x128xf32>
    %187 = math.exp %186 : vector<8x128xf32>
    %cst_49 = arith.constant 1.000000e+00 : f32
    %188 = vector.broadcast %cst_49 : f32 to vector<8x128xf32>
    %189 = arith.addf %188, %187 : vector<8x128xf32>
    %190 = arith.divf %188, %189 : vector<8x128xf32>
    %191 = math.tanh %185 : vector<8x128xf32>
    %192 = vector.extract_strided_slice %190 {offsets = [0, 0], sizes = [8, 32], strides = [1, 1]} : vector<8x128xf32> to vector<8x32xf32>
    %193 = vector.extract_strided_slice %190 {offsets = [0, 32], sizes = [8, 32], strides = [1, 1]} : vector<8x128xf32> to vector<8x32xf32>
    %194 = vector.extract_strided_slice %191 {offsets = [0, 64], sizes = [8, 32], strides = [1, 1]} : vector<8x128xf32> to vector<8x32xf32>
    %195 = vector.extract_strided_slice %190 {offsets = [0, 96], sizes = [8, 32], strides = [1, 1]} : vector<8x128xf32> to vector<8x32xf32>
    %196 = arith.mulf %193, %174 : vector<8x32xf32>
    %197 = arith.mulf %192, %194 : vector<8x32xf32>
    %198 = arith.addf %196, %197 : vector<8x32xf32>
    %199 = math.tanh %198 : vector<8x32xf32>
    %200 = arith.mulf %195, %199 : vector<8x32xf32>
    %201 = arith.truncf %200 : vector<8x32xf32> to vector<8x32xbf16>
    %202 = arith.index_cast %181 : i32 to index
    %c0_50 = arith.constant 0 : index
    %203 = vector.load %arg8[%202, %c0_50] : memref<64x32xbf16, #tpu.memory_space<vmem>>, vector<8x32xbf16>
    tpu.vector_store %arg8[%202, %c0_50], %201 {strides = array<i32>} : memref<64x32xbf16, #tpu.memory_space<vmem>>, vector<8x32xbf16>,
    %c8_i32_51 = arith.constant 8 : i32
    %c0_52 = arith.constant 0 : index
    %c0_53 = arith.constant 0 : index
    %204 = vector.load %arg8[%c0_52, %c0_53] : memref<64x32xbf16, #tpu.memory_space<vmem>>, vector<64x32xbf16>
    %c0_54 = arith.constant 0 : index
    %c0_55 = arith.constant 0 : index
    %c0_56 = arith.constant 0 : index
    %205 = vector.load %arg3[%c0_54, %c0_55, %c0_56] : memref<1x32x128xbf16, #tpu.memory_space<vmem>>, vector<1x32x128xbf16>
    %206 = vector.shape_cast %205 : vector<1x32x128xbf16> to vector<32x128xbf16>
    %cst_57 = arith.constant dense<0.000000e+00> : vector<64x128xf32>
    %207 = tpu.matmul %204, %206, %cst_57 {dimension_numbers = #tpu.dot_dimension_numbers<[1], [0], [0], [1], [0, 0, 1, 1], [], []>} : vector<64x32xbf16>, vector<32x128xbf16>, vector<64x128xf32> -> vector<64x128xf32>
    %c0_58 = arith.constant 0 : index
    %c0_59 = arith.constant 0 : index
    %c0_60 = arith.constant 0 : index
    %208 = vector.load %arg5[%c0_58, %c0_59, %c0_60] : memref<1x1x128xf32, #tpu.memory_space<vmem>>, vector<1x1x128xf32>
    %209 = vector.shape_cast %208 : vector<1x1x128xf32> to vector<1x128xf32>
    %210 = vector.broadcast %209 : vector<1x128xf32> to vector<64x128xf32>
    %211 = arith.addf %207, %210 : vector<64x128xf32>
    %c0_61 = arith.constant 0 : index
    %c0_62 = arith.constant 0 : index
    %212 = vector.load %arg7[%c0_61, %c0_62] : memref<64x128xf32, #tpu.memory_space<vmem>>, vector<64x128xf32>
    tpu.vector_store %arg7[%c0_61, %c0_62], %211 {strides = array<i32>} : memref<64x128xf32, #tpu.memory_space<vmem>>, vector<64x128xf32>,
    %c1 = arith.constant 1 : index
    %c0_63 = arith.constant 0 : index
    %c0_64 = arith.constant 0 : index
    %213 = vector.load %arg4[%c1, %c0_63, %c0_64] : memref<2x32x128xbf16, #tpu.memory_space<vmem>>, vector<1x32x128xbf16>
    %214 = vector.shape_cast %213 : vector<1x32x128xbf16> to vector<32x128xbf16>
    %cst_65 = arith.constant 0.000000e+00 : f32
    %215 = vector.broadcast %cst_65 : f32 to vector<8x32xf32>
    %216 = arith.truncf %215 : vector<8x32xf32> to vector<8x32xbf16>
    %cst_66 = arith.constant 0.000000e+00 : f32
    %217 = vector.broadcast %cst_66 : f32 to vector<8x32xf32>
    %c0_i32_67 = arith.constant 0 : i32
    %c8_i32_68 = arith.constant 8 : i32
    %218 = arith.muli %c0_i32_67, %c8_i32_68 : i32
    %219 = tpu.assume_multiple %218, 8 : i32
    %220 = arith.index_cast %219 : i32 to index
    %c0_69 = arith.constant 0 : index
    %221 = vector.load %arg7[%220, %c0_69] : memref<64x128xf32, #tpu.memory_space<vmem>>, vector<8x128xf32>
    %cst_70 = arith.constant dense<0.000000e+00> : vector<8x128xf32>
    %222 = tpu.matmul %216, %214, %cst_70 {dimension_numbers = #tpu.dot_dimension_numbers<[1], [0], [0], [1], [0, 0, 1, 1], [], []>} : vector<8x32xbf16>, vector<32x128xbf16>, vector<8x128xf32> -> vector<8x128xf32>
    %223 = arith.addf %221, %222 : vector<8x128xf32>
    %224 = arith.negf %223 : vector<8x128xf32>
    %225 = math.exp %224 : vector<8x128xf32>
    %cst_71 = arith.constant 1.000000e+00 : f32
    %226 = vector.broadcast %cst_71 : f32 to vector<8x128xf32>
    %227 = arith.addf %226, %225 : vector<8x128xf32>
    %228 = arith.divf %226, %227 : vector<8x128xf32>
    %229 = math.tanh %223 : vector<8x128xf32>
    %230 = vector.extract_strided_slice %228 {offsets = [0, 0], sizes = [8, 32], strides = [1, 1]} : vector<8x128xf32> to vector<8x32xf32>
    %231 = vector.extract_strided_slice %228 {offsets = [0, 32], sizes = [8, 32], strides = [1, 1]} : vector<8x128xf32> to vector<8x32xf32>
    %232 = vector.extract_strided_slice %229 {offsets = [0, 64], sizes = [8, 32], strides = [1, 1]} : vector<8x128xf32> to vector<8x32xf32>
    %233 = vector.extract_strided_slice %228 {offsets = [0, 96], sizes = [8, 32], strides = [1, 1]} : vector<8x128xf32> to vector<8x32xf32>
    %234 = arith.mulf %231, %217 : vector<8x32xf32>
    %235 = arith.mulf %230, %232 : vector<8x32xf32>
    %236 = arith.addf %234, %235 : vector<8x32xf32>
    %237 = math.tanh %236 : vector<8x32xf32>
    %238 = arith.mulf %233, %237 : vector<8x32xf32>
    %239 = arith.truncf %238 : vector<8x32xf32> to vector<8x32xbf16>
    %c1_i32_72 = arith.constant 1 : i32
    %c8_i32_73 = arith.constant 8 : i32
    %240 = arith.muli %c1_i32_72, %c8_i32_73 : i32
    %241 = tpu.assume_multiple %240, 8 : i32
    %242 = arith.index_cast %241 : i32 to index
    %c0_74 = arith.constant 0 : index
    %243 = vector.load %arg7[%242, %c0_74] : memref<64x128xf32, #tpu.memory_space<vmem>>, vector<8x128xf32>
    %cst_75 = arith.constant dense<0.000000e+00> : vector<8x128xf32>
    %244 = tpu.matmul %239, %214, %cst_75 {dimension_numbers = #tpu.dot_dimension_numbers<[1], [0], [0], [1], [0, 0, 1, 1], [], []>} : vector<8x32xbf16>, vector<32x128xbf16>, vector<8x128xf32> -> vector<8x128xf32>
    %245 = arith.addf %243, %244 : vector<8x128xf32>
    %246 = arith.negf %245 : vector<8x128xf32>
    %247 = math.exp %246 : vector<8x128xf32>
    %cst_76 = arith.constant 1.000000e+00 : f32
    %248 = vector.broadcast %cst_76 : f32 to vector<8x128xf32>
    %249 = arith.addf %248, %247 : vector<8x128xf32>
    %250 = arith.divf %248, %249 : vector<8x128xf32>
    %251 = math.tanh %245 : vector<8x128xf32>
    %252 = vector.extract_strided_slice %250 {offsets = [0, 0], sizes = [8, 32], strides = [1, 1]} : vector<8x128xf32> to vector<8x32xf32>
    %253 = vector.extract_strided_slice %250 {offsets = [0, 32], sizes = [8, 32], strides = [1, 1]} : vector<8x128xf32> to vector<8x32xf32>
    %254 = vector.extract_strided_slice %251 {offsets = [0, 64], sizes = [8, 32], strides = [1, 1]} : vector<8x128xf32> to vector<8x32xf32>
    %255 = vector.extract_strided_slice %250 {offsets = [0, 96], sizes = [8, 32], strides = [1, 1]} : vector<8x128xf32> to vector<8x32xf32>
    %256 = arith.mulf %253, %236 : vector<8x32xf32>
    %257 = arith.mulf %252, %254 : vector<8x32xf32>
    %258 = arith.addf %256, %257 : vector<8x32xf32>
    %259 = math.tanh %258 : vector<8x32xf32>
    %260 = arith.mulf %255, %259 : vector<8x32xf32>
    %261 = arith.truncf %260 : vector<8x32xf32> to vector<8x32xbf16>
    %c2_i32_77 = arith.constant 2 : i32
    %c8_i32_78 = arith.constant 8 : i32
    %262 = arith.muli %c2_i32_77, %c8_i32_78 : i32
    %263 = tpu.assume_multiple %262, 8 : i32
    %264 = arith.index_cast %263 : i32 to index
    %c0_79 = arith.constant 0 : index
    %265 = vector.load %arg7[%264, %c0_79] : memref<64x128xf32, #tpu.memory_space<vmem>>, vector<8x128xf32>
    %cst_80 = arith.constant dense<0.000000e+00> : vector<8x128xf32>
    %266 = tpu.matmul %261, %214, %cst_80 {dimension_numbers = #tpu.dot_dimension_numbers<[1], [0], [0], [1], [0, 0, 1, 1], [], []>} : vector<8x32xbf16>, vector<32x128xbf16>, vector<8x128xf32> -> vector<8x128xf32>
    %267 = arith.addf %265, %266 : vector<8x128xf32>
    %268 = arith.negf %267 : vector<8x128xf32>
    %269 = math.exp %268 : vector<8x128xf32>
    %cst_81 = arith.constant 1.000000e+00 : f32
    %270 = vector.broadcast %cst_81 : f32 to vector<8x128xf32>
    %271 = arith.addf %270, %269 : vector<8x128xf32>
    %272 = arith.divf %270, %271 : vector<8x128xf32>
    %273 = math.tanh %267 : vector<8x128xf32>
    %274 = vector.extract_strided_slice %272 {offsets = [0, 0], sizes = [8, 32], strides = [1, 1]} : vector<8x128xf32> to vector<8x32xf32>
    %275 = vector.extract_strided_slice %272 {offsets = [0, 32], sizes = [8, 32], strides = [1, 1]} : vector<8x128xf32> to vector<8x32xf32>
    %276 = vector.extract_strided_slice %273 {offsets = [0, 64], sizes = [8, 32], strides = [1, 1]} : vector<8x128xf32> to vector<8x32xf32>
    %277 = vector.extract_strided_slice %272 {offsets = [0, 96], sizes = [8, 32], strides = [1, 1]} : vector<8x128xf32> to vector<8x32xf32>
    %278 = arith.mulf %275, %258 : vector<8x32xf32>
    %279 = arith.mulf %274, %276 : vector<8x32xf32>
    %280 = arith.addf %278, %279 : vector<8x32xf32>
    %281 = math.tanh %280 : vector<8x32xf32>
    %282 = arith.mulf %277, %281 : vector<8x32xf32>
    %283 = arith.truncf %282 : vector<8x32xf32> to vector<8x32xbf16>
    %c3_i32_82 = arith.constant 3 : i32
    %c8_i32_83 = arith.constant 8 : i32
    %284 = arith.muli %c3_i32_82, %c8_i32_83 : i32
    %285 = tpu.assume_multiple %284, 8 : i32
    %286 = arith.index_cast %285 : i32 to index
    %c0_84 = arith.constant 0 : index
    %287 = vector.load %arg7[%286, %c0_84] : memref<64x128xf32, #tpu.memory_space<vmem>>, vector<8x128xf32>
    %cst_85 = arith.constant dense<0.000000e+00> : vector<8x128xf32>
    %288 = tpu.matmul %283, %214, %cst_85 {dimension_numbers = #tpu.dot_dimension_numbers<[1], [0], [0], [1], [0, 0, 1, 1], [], []>} : vector<8x32xbf16>, vector<32x128xbf16>, vector<8x128xf32> -> vector<8x128xf32>
    %289 = arith.addf %287, %288 : vector<8x128xf32>
    %290 = arith.negf %289 : vector<8x128xf32>
    %291 = math.exp %290 : vector<8x128xf32>
    %cst_86 = arith.constant 1.000000e+00 : f32
    %292 = vector.broadcast %cst_86 : f32 to vector<8x128xf32>
    %293 = arith.addf %292, %291 : vector<8x128xf32>
    %294 = arith.divf %292, %293 : vector<8x128xf32>
    %295 = math.tanh %289 : vector<8x128xf32>
    %296 = vector.extract_strided_slice %294 {offsets = [0, 0], sizes = [8, 32], strides = [1, 1]} : vector<8x128xf32> to vector<8x32xf32>
    %297 = vector.extract_strided_slice %294 {offsets = [0, 32], sizes = [8, 32], strides = [1, 1]} : vector<8x128xf32> to vector<8x32xf32>
    %298 = vector.extract_strided_slice %295 {offsets = [0, 64], sizes = [8, 32], strides = [1, 1]} : vector<8x128xf32> to vector<8x32xf32>
    %299 = vector.extract_strided_slice %294 {offsets = [0, 96], sizes = [8, 32], strides = [1, 1]} : vector<8x128xf32> to vector<8x32xf32>
    %300 = arith.mulf %297, %280 : vector<8x32xf32>
    %301 = arith.mulf %296, %298 : vector<8x32xf32>
    %302 = arith.addf %300, %301 : vector<8x32xf32>
    %303 = math.tanh %302 : vector<8x32xf32>
    %304 = arith.mulf %299, %303 : vector<8x32xf32>
    %305 = arith.truncf %304 : vector<8x32xf32> to vector<8x32xbf16>
    %c4_i32_87 = arith.constant 4 : i32
    %c8_i32_88 = arith.constant 8 : i32
    %306 = arith.muli %c4_i32_87, %c8_i32_88 : i32
    %307 = tpu.assume_multiple %306, 8 : i32
    %308 = arith.index_cast %307 : i32 to index
    %c0_89 = arith.constant 0 : index
    %309 = vector.load %arg7[%308, %c0_89] : memref<64x128xf32, #tpu.memory_space<vmem>>, vector<8x128xf32>
    %cst_90 = arith.constant dense<0.000000e+00> : vector<8x128xf32>
    %310 = tpu.matmul %305, %214, %cst_90 {dimension_numbers = #tpu.dot_dimension_numbers<[1], [0], [0], [1], [0, 0, 1, 1], [], []>} : vector<8x32xbf16>, vector<32x128xbf16>, vector<8x128xf32> -> vector<8x128xf32>
    %311 = arith.addf %309, %310 : vector<8x128xf32>
    %312 = arith.negf %311 : vector<8x128xf32>
    %313 = math.exp %312 : vector<8x128xf32>
    %cst_91 = arith.constant 1.000000e+00 : f32
    %314 = vector.broadcast %cst_91 : f32 to vector<8x128xf32>
    %315 = arith.addf %314, %313 : vector<8x128xf32>
    %316 = arith.divf %314, %315 : vector<8x128xf32>
    %317 = math.tanh %311 : vector<8x128xf32>
    %318 = vector.extract_strided_slice %316 {offsets = [0, 0], sizes = [8, 32], strides = [1, 1]} : vector<8x128xf32> to vector<8x32xf32>
    %319 = vector.extract_strided_slice %316 {offsets = [0, 32], sizes = [8, 32], strides = [1, 1]} : vector<8x128xf32> to vector<8x32xf32>
    %320 = vector.extract_strided_slice %317 {offsets = [0, 64], sizes = [8, 32], strides = [1, 1]} : vector<8x128xf32> to vector<8x32xf32>
    %321 = vector.extract_strided_slice %316 {offsets = [0, 96], sizes = [8, 32], strides = [1, 1]} : vector<8x128xf32> to vector<8x32xf32>
    %322 = arith.mulf %319, %302 : vector<8x32xf32>
    %323 = arith.mulf %318, %320 : vector<8x32xf32>
    %324 = arith.addf %322, %323 : vector<8x32xf32>
    %325 = math.tanh %324 : vector<8x32xf32>
    %326 = arith.mulf %321, %325 : vector<8x32xf32>
    %327 = arith.truncf %326 : vector<8x32xf32> to vector<8x32xbf16>
    %c5_i32_92 = arith.constant 5 : i32
    %c8_i32_93 = arith.constant 8 : i32
    %328 = arith.muli %c5_i32_92, %c8_i32_93 : i32
    %329 = tpu.assume_multiple %328, 8 : i32
    %330 = arith.index_cast %329 : i32 to index
    %c0_94 = arith.constant 0 : index
    %331 = vector.load %arg7[%330, %c0_94] : memref<64x128xf32, #tpu.memory_space<vmem>>, vector<8x128xf32>
    %cst_95 = arith.constant dense<0.000000e+00> : vector<8x128xf32>
    %332 = tpu.matmul %327, %214, %cst_95 {dimension_numbers = #tpu.dot_dimension_numbers<[1], [0], [0], [1], [0, 0, 1, 1], [], []>} : vector<8x32xbf16>, vector<32x128xbf16>, vector<8x128xf32> -> vector<8x128xf32>
    %333 = arith.addf %331, %332 : vector<8x128xf32>
    %334 = arith.negf %333 : vector<8x128xf32>
    %335 = math.exp %334 : vector<8x128xf32>
    %cst_96 = arith.constant 1.000000e+00 : f32
    %336 = vector.broadcast %cst_96 : f32 to vector<8x128xf32>
    %337 = arith.addf %336, %335 : vector<8x128xf32>
    %338 = arith.divf %336, %337 : vector<8x128xf32>
    %339 = math.tanh %333 : vector<8x128xf32>
    %340 = vector.extract_strided_slice %338 {offsets = [0, 0], sizes = [8, 32], strides = [1, 1]} : vector<8x128xf32> to vector<8x32xf32>
    %341 = vector.extract_strided_slice %338 {offsets = [0, 32], sizes = [8, 32], strides = [1, 1]} : vector<8x128xf32> to vector<8x32xf32>
    %342 = vector.extract_strided_slice %339 {offsets = [0, 64], sizes = [8, 32], strides = [1, 1]} : vector<8x128xf32> to vector<8x32xf32>
    %343 = vector.extract_strided_slice %338 {offsets = [0, 96], sizes = [8, 32], strides = [1, 1]} : vector<8x128xf32> to vector<8x32xf32>
    %344 = arith.mulf %341, %324 : vector<8x32xf32>
    %345 = arith.mulf %340, %342 : vector<8x32xf32>
    %346 = arith.addf %344, %345 : vector<8x32xf32>
    %347 = math.tanh %346 : vector<8x32xf32>
    %348 = arith.mulf %343, %347 : vector<8x32xf32>
    %349 = arith.truncf %348 : vector<8x32xf32> to vector<8x32xbf16>
    %c6_i32_97 = arith.constant 6 : i32
    %c8_i32_98 = arith.constant 8 : i32
    %350 = arith.muli %c6_i32_97, %c8_i32_98 : i32
    %351 = tpu.assume_multiple %350, 8 : i32
    %352 = arith.index_cast %351 : i32 to index
    %c0_99 = arith.constant 0 : index
    %353 = vector.load %arg7[%352, %c0_99] : memref<64x128xf32, #tpu.memory_space<vmem>>, vector<8x128xf32>
    %cst_100 = arith.constant dense<0.000000e+00> : vector<8x128xf32>
    %354 = tpu.matmul %349, %214, %cst_100 {dimension_numbers = #tpu.dot_dimension_numbers<[1], [0], [0], [1], [0, 0, 1, 1], [], []>} : vector<8x32xbf16>, vector<32x128xbf16>, vector<8x128xf32> -> vector<8x128xf32>
    %355 = arith.addf %353, %354 : vector<8x128xf32>
    %356 = arith.negf %355 : vector<8x128xf32>
    %357 = math.exp %356 : vector<8x128xf32>
    %cst_101 = arith.constant 1.000000e+00 : f32
    %358 = vector.broadcast %cst_101 : f32 to vector<8x128xf32>
    %359 = arith.addf %358, %357 : vector<8x128xf32>
    %360 = arith.divf %358, %359 : vector<8x128xf32>
    %361 = math.tanh %355 : vector<8x128xf32>
    %362 = vector.extract_strided_slice %360 {offsets = [0, 0], sizes = [8, 32], strides = [1, 1]} : vector<8x128xf32> to vector<8x32xf32>
    %363 = vector.extract_strided_slice %360 {offsets = [0, 32], sizes = [8, 32], strides = [1, 1]} : vector<8x128xf32> to vector<8x32xf32>
    %364 = vector.extract_strided_slice %361 {offsets = [0, 64], sizes = [8, 32], strides = [1, 1]} : vector<8x128xf32> to vector<8x32xf32>
    %365 = vector.extract_strided_slice %360 {offsets = [0, 96], sizes = [8, 32], strides = [1, 1]} : vector<8x128xf32> to vector<8x32xf32>
    %366 = arith.mulf %363, %346 : vector<8x32xf32>
    %367 = arith.mulf %362, %364 : vector<8x32xf32>
    %368 = arith.addf %366, %367 : vector<8x32xf32>
    %369 = math.tanh %368 : vector<8x32xf32>
    %370 = arith.mulf %365, %369 : vector<8x32xf32>
    %371 = arith.truncf %370 : vector<8x32xf32> to vector<8x32xbf16>
    %c7_i32_102 = arith.constant 7 : i32
    %c8_i32_103 = arith.constant 8 : i32
    %372 = arith.muli %c7_i32_102, %c8_i32_103 : i32
    %373 = tpu.assume_multiple %372, 8 : i32
    %374 = arith.index_cast %373 : i32 to index
    %c0_104 = arith.constant 0 : index
    %375 = vector.load %arg7[%374, %c0_104] : memref<64x128xf32, #tpu.memory_space<vmem>>, vector<8x128xf32>
    %cst_105 = arith.constant dense<0.000000e+00> : vector<8x128xf32>
    %376 = tpu.matmul %371, %214, %cst_105 {dimension_numbers = #tpu.dot_dimension_numbers<[1], [0], [0], [1], [0, 0, 1, 1], [], []>} : vector<8x32xbf16>, vector<32x128xbf16>, vector<8x128xf32> -> vector<8x128xf32>
    %377 = arith.addf %375, %376 : vector<8x128xf32>
    %378 = arith.negf %377 : vector<8x128xf32>
    %379 = math.exp %378 : vector<8x128xf32>
    %cst_106 = arith.constant 1.000000e+00 : f32
    %380 = vector.broadcast %cst_106 : f32 to vector<8x128xf32>
    %381 = arith.addf %380, %379 : vector<8x128xf32>
    %382 = arith.divf %380, %381 : vector<8x128xf32>
    %383 = math.tanh %377 : vector<8x128xf32>
    %384 = vector.extract_strided_slice %382 {offsets = [0, 0], sizes = [8, 32], strides = [1, 1]} : vector<8x128xf32> to vector<8x32xf32>
    %385 = vector.extract_strided_slice %382 {offsets = [0, 32], sizes = [8, 32], strides = [1, 1]} : vector<8x128xf32> to vector<8x32xf32>
    %386 = vector.extract_strided_slice %383 {offsets = [0, 64], sizes = [8, 32], strides = [1, 1]} : vector<8x128xf32> to vector<8x32xf32>
    %387 = vector.extract_strided_slice %382 {offsets = [0, 96], sizes = [8, 32], strides = [1, 1]} : vector<8x128xf32> to vector<8x32xf32>
    %388 = arith.mulf %385, %368 : vector<8x32xf32>
    %389 = arith.mulf %384, %386 : vector<8x32xf32>
    %390 = arith.addf %388, %389 : vector<8x32xf32>
    %391 = math.tanh %390 : vector<8x32xf32>
    %392 = arith.mulf %387, %391 : vector<8x32xf32>
    %393 = arith.truncf %392 : vector<8x32xf32> to vector<8x32xbf16>
    %c8_i32_107 = arith.constant 8 : i32
    %c0_108 = arith.constant 0 : index
    %c0_109 = arith.constant 0 : index
    %394 = vector.load %arg6[%c0_108, %c0_109] : memref<8x32xf32, #tpu.memory_space<vmem>>, vector<8x32xf32>
    tpu.vector_store %arg6[%c0_108, %c0_109], %392 {strides = array<i32>} : memref<8x32xf32, #tpu.memory_space<vmem>>, vector<8x32xf32>,
    return
  }
}

</mosaic_0001>

<bundles_post_ra>
// kernel: tpu_custom_call.1
= control target key start
LH: loop header
LB: loop body
LE: loop exit
PB: predicated region body
PF: predicated region fallthrough
CT: control target
= control target key end

     0   :  { %11 = vsyncpa [#allocation5], 0  ;;  %s2439_s0 = inlined_call_operand.vmem [shape: bf16[64,16], index: 0, kind: input, shape index: {}]   ;;  %s2440_s1 = inlined_call_operand.vmem [shape: bf16[16,128], index: 1, kind: input, shape index: {}]   ;;  %s2441_s2 = inlined_call_operand.vmem [shape: f32[1,128], index: 2, kind: input, shape index: {}]   ;;  %s2442_s3 = inlined_call_operand.hbm [shape: bf16[1,32,128], index: 3, kind: input, shape index: {}]   ;;  %s2443_s4 = inlined_call_operand.vmem [shape: bf16[2,32,128], index: 4, kind: input, shape index: {}]   ;;  %s2444_s5 = inlined_call_operand.vmem [shape: f32[1,1,128], index: 5, kind: input, shape index: {}]   ;;  %s2445_s6 = inlined_call_operand.hbm [shape: f32[8,32], index: 6, kind: output, shape index: {}]  }
   0x1   :  { %12 = vsyncpa [#allocation6], 0  ;;  %s2059_s21 = smov [#allocation4]  }
   0x2   :  { %s24_s22 = sshll.u32 %s2059_s21, 4  ;;  %s25_s22 = int_to_ptr.vmem [resolvable:$true] %s24_s22 }
   0x3   :  { %s2023_s23 = scalar_lea.vmem %s25_s22, 256  ;;  %p2028_p1 = scmp.lt.s32.totalorder %s25_s22, %s25_s22 }
   0x4   :  { %p2024_p0 = scmp.ne.s32.totalorder %s25_s22, %s2023_s23  ;;  %p2029_p2 = scmp.lt.s32.totalorder %s2023_s23, %s2023_s23 }
   0x6   :  { %p2030_p3 = por %p2029_p2, %p2028_p1 }
   0x8   :  { %p2031_p4 = pnand %p2030_p3, %p2024_p0 }
   0xa   :  { %2034 = shalt.err (!%p2031_p4)
}
   0xb   :  { %s2060_s24 = smov 64   ;;  %s2061_s25 = smov 4  }
   0xc   :  { %30 = dma.hbm_to_vmem [thread:$0]  %s2442_s3, 256, %s25_s22, [#allocation5], %s2060_s24, %s2060_s24, %s2061_s25  }
   0xd   :  { %2055 = dma.done.wait [#allocation5], 256  }
   0xe   :  { %2056 = vsyncadd [#allocation5], 4294967040  ;;  %v2062_v0 = vmov 0.0   ;;  %vm2063_vm0 = vmmov 0   ;;  %v1872_v1 = vld [vmem:[%s2440_s1] sm:$0xff]   ;;  %v2116_v2 = vld [vmem:[%s2443_s4 + $0x8] sm:$0xff]  }
   0xf   :  { %1724 = vmatprep.subr.bf16.mxu1 %v2062_v0  ;;  %1728 = vmatprep.mubr.msk.bf16.mxu1 %vm2063_vm0, %v2062_v0  ;;  %vm82_vm1 = vcmask 130048   ;;  %v1874_v3 = vld [vmem:[%s2439_s0] sm:$0xff]   ;;  %v1875_v4 = vld [vmem:[%s2439_s0 + $0x8] sm:$0xff]   ;;  %v2064_v6 = vmov 0   ;;  %vm185_vm2 = vcmask 261120   ;;  %v1877_v49 = vld [vmem:[%s2439_s0 + $0x10] sm:$0xff]  }
  0x10   :  { %1714 = vmatprep.subr.bf16.mxu0 %v1872_v1  ;;  %1725 = vmatpush3.bf16.msra.mxu1 %v2116_v2  ;;  %v2130_v5 = vld [vmem:[%s2443_s4] sm:$0xff]   ;;  %v1878_v50 = vld [vmem:[%s2439_s0 + $0x18] sm:$0xff]   ;;  %vm261_vm3 = vcmask 257024  }
  0x11   :  { %1715 = vmatpush3.bf16.msra.mxu0 %v1872_v1  ;;  %1716 = vmatprep.mubr.msk.bf16.mxu0 %vm82_vm1, %v1874_v3  ;;  %v2152_v8 = vld [vmem:[%s2441_s2] ss:$0 sm:$0xff]  ;;  %s2065_s2 = smov 32  }
  0x12   :  { %1726 = vmatprep.subr.bf16.mxu1 %v2062_v0  ;;  %1740 = vmatprep.subr.bf16.mxu0 %v2062_v0 }
  0x14   :  { %1717 = vmatmul.mubr.msk.bf16.vlgmr.msra.gmra.mxu0 %vm82_vm1, %v1875_v4  ;;  %1727 = vmatpush3.bf16.msra.mxu1 %v2130_v5 }
  0x15   :  { %1741 = vmatpush3.bf16.msra.mxu0 %v2116_v2  ;;  %1732 = vmatprep.subr.bf16.mxu1 %v2062_v0 }
  0x16   :  { %1742 = vmatprep.subr.bf16.mxu0 %v2062_v0  ;;  %1720 = vmatprep.mubr.msk.bf16.mxu0 %vm82_vm1, %v1877_v49 }
  0x17   :  { %1729 = vmatmul.mubr.bf16.vlgmr.msra.gmra.mxu1 %v2064_v6 }
  0x18   :  { %1733 = vmatpush3.bf16.msra.mxu1 %v2116_v2  ;;  %1736 = vmatprep.mubr.msk.bf16.mxu1 %vm2063_vm0, %v2062_v0 }
  0x19   :  { %1734 = vmatprep.subr.bf16.mxu1 %v2062_v0  ;;  %1743 = vmatpush3.bf16.msra.mxu0 %v2130_v5 }
  0x1a   :  { %1756 = vmatprep.subr.bf16.mxu0 %v2062_v0 }
  0x1c   :  { %1735 = vmatpush3.bf16.msra.mxu1 %v2130_v5  ;;  %1721 = vmatmul.mubr.msk.bf16.gmra.mxu0 %vm82_vm1, %v1878_v50 }
  0x1d   :  { %1748 = vmatprep.subr.bf16.mxu1 %v2062_v0  ;;  %1744 = vmatprep.mubr.msk.bf16.mxu0 %vm2063_vm0, %v2062_v0 }
  0xd4   :  { %v2147_v7 = vpop.f32.mrf.mxu0 }
  0xd5   :  { %v138_v60 = vadd.f32 %v2147_v7, %v2152_v8 }
  0xd6   :  { %v129_v9 = vpop.f32.mrf.mxu0 }
  0xd7   :  { %v130_v10 = vadd.f32 %v2152_v8, %v129_v9  ;;  %v223_v11 = vpop.f32.mrf.mxu1 }
  0xd8   :  { %v2169_v31 = vpop.f32.mrf.mxu0 }
  0xd9   :  { %v229_v12 = vadd.f32 %v223_v11, %v130_v10  ;;  %v1730_v13 = vpop.f32.mrf.mxu1 }
  0xda   :  { %v132_v32 = vpop.f32.mrf.mxu0 }
  0xdb   :  { %1887 = vtanh.f32 %v229_v12  ;;  %v226_v14 = vpop.f32.mrf.mxu1  ;;  %v1592_v17 = vmul.f32 -1.442695, %v229_v12  ;;  %v133_v33 = vadd.f32 %v2152_v8, %v132_v32 }
  0xdc   :  { %v2196_v56 = vpop.f32.mrf.mxu0 }
  0xdd   :  { %v1731_v15 = vpop.f32.mrf.mxu1  ;;  %1889 = vpow2.f32 %v1592_v17 }
  0xde   :  { %v2198_v57 = vpop.f32.mrf.mxu0 }
  0xe0   :  { %v2200_v58 = vpop.f32.mrf.mxu0 }
  0xe2   :  { %v2202_v59 = vpop.f32.mrf.mxu0 }
  0xe8   :  { %v1888_v16 = vpop.eup %1887 }
  0xe9   :  { %239 = vrot.lane.b32.xlu0 %v1888_v16, %s2060_s24 }
  0xea   :  { %v1890_v18 = vpop.eup %1889 }
  0xeb   :  { %v233_v19 = vadd.f32 1.0, %v1890_v18 }
  0xed   :  { %1891 = vrcp.f32 %v233_v19 }
  0xfa   :  { %v1892_v20 = vpop.eup %1891 }
  0xfb   :  { %v237_v23 = vmul.f32 0.0, %v1892_v20 }
 0x15b   :  { %v240_v21 = vpop.permute.xlu0 %239 }
 0x15c   :  { %v242_v22 = vmul.f32 %v1892_v20, %v240_v21 }
 0x15e   :  { %244 = vrot.lane.b32.xlu0 %v242_v22, %s2065_s2  ;;  %v141_v22 = vadd.f32 %v2169_v31, %v2152_v8 }
 0x1d0   :  { %v245_v24 = vpop.permute.xlu0 %244 }
 0x1d1   :  { %v247_v25 = vadd.f32 %v245_v24, %v237_v23 }
 0x1d3   :  { %1893 = vtanh.f32 %v247_v25 }
 0x1e0   :  { %v1894_v26 = vpop.eup %1893 }
 0x1e1   :  { %250 = vrot.lane.b32.xlu1 %v1894_v26, %s2060_s24 }
 0x253   :  { %v251_v27 = vpop.permute.xlu1 %250 }
 0x254   :  { %v253_v28 = vmul.f32 %v1892_v20, %v251_v27 }
 0x256   :  { %v2158_v29 = vpack.c.bf16 %v253_v28, %v253_v28 }
 0x258   :  { %265 = vrot.lane.b32.xlu1 %v2158_v29, %s2065_s2 }
 0x2ca   :  { %v266_v30 = vpop.permute.xlu1 %265 }
 0x2cb   :  { %1737 = vmatmul.mubr.msk.bf16.vlgmr.msra.gmra.mxu1 %vm185_vm2, %v266_v30 }
 0x2cc   :  { %1749 = vmatpush3.bf16.msra.mxu1 %v2116_v2  ;;  %1752 = vmatprep.mubr.msk.bf16.mxu1 %vm2063_vm0, %v2062_v0 }
 0x2cd   :  { %1750 = vmatprep.subr.bf16.mxu1 %v2062_v0 }
 0x2d0   :  { %1751 = vmatpush3.bf16.msra.mxu1 %v2130_v5 }
 0x2d1   :  { %1764 = vmatprep.subr.bf16.mxu1 %v2062_v0 }
 0x38b   :  { %v304_v34 = vpop.f32.mrf.mxu1 }
 0x38c   :  { %v310_v35 = vadd.f32 %v304_v34, %v133_v33 }
 0x38d   :  { %v1738_v36 = vpop.f32.mrf.mxu1 }
 0x38e   :  { %1895 = vtanh.f32 %v310_v35  ;;  %v1595_v40 = vmul.f32 -1.442695, %v310_v35 }
 0x38f   :  { %v307_v37 = vpop.f32.mrf.mxu1 }
 0x390   :  { %1897 = vpow2.f32 %v1595_v40 }
 0x391   :  { %v1739_v38 = vpop.f32.mrf.mxu1 }
 0x39b   :  { %v1896_v39 = vpop.eup %1895 }
 0x39c   :  { %320 = vrot.lane.b32.xlu0 %v1896_v39, %s2060_s24 }
 0x39d   :  { %v1898_v41 = vpop.eup %1897 }
 0x39e   :  { %v314_v42 = vadd.f32 1.0, %v1898_v41 }
 0x3a0   :  { %1899 = vrcp.f32 %v314_v42 }
 0x3ad   :  { %v1900_v43 = vpop.eup %1899 }
 0x3ae   :  { %v318_v46 = vmul.f32 %v1900_v43, %v247_v25 }
 0x40e   :  { %v321_v44 = vpop.permute.xlu0 %320 }
 0x40f   :  { %v323_v45 = vmul.f32 %v1900_v43, %v321_v44  ;;  %v146_v44 = vadd.f32 %v2152_v8, %v2198_v57 }
 0x411   :  { %325 = vrot.lane.b32.xlu1 %v323_v45, %s2065_s2 }
 0x483   :  { %v326_v47 = vpop.permute.xlu1 %325 }
 0x484   :  { %v328_v48 = vadd.f32 %v326_v47, %v318_v46 }
 0x486   :  { %1901 = vtanh.f32 %v328_v48 }
 0x493   :  { %v1902_v51 = vpop.eup %1901 }
 0x494   :  { %331 = vrot.lane.b32.xlu0 %v1902_v51, %s2060_s24 }
 0x506   :  { %v332_v52 = vpop.permute.xlu0 %331 }
 0x507   :  { %v334_v53 = vmul.f32 %v1900_v43, %v332_v52 }
 0x509   :  { %v2185_v54 = vpack.c.bf16 %v334_v53, %v334_v53 }
 0x50b   :  { %346 = vrot.lane.b32.xlu1 %v2185_v54, %s2065_s2 }
 0x57d   :  { %v347_v55 = vpop.permute.xlu1 %346 }
 0x57e   :  { %1745 = vmatmul.mubr.msk.bf16.vlgmr.msra.gmra.mxu0 %vm185_vm2, %v347_v55 }
 0x57f   :  { %1757 = vmatpush3.bf16.msra.mxu0 %v2116_v2  ;;  %1760 = vmatprep.mubr.msk.bf16.mxu0 %vm2063_vm0, %v2062_v0 }
 0x580   :  { %1758 = vmatprep.subr.bf16.mxu0 %v2062_v0 }
 0x583   :  { %1759 = vmatpush3.bf16.msra.mxu0 %v2130_v5 }
 0x584   :  { %1772 = vmatprep.subr.bf16.mxu0 %v2062_v0 }
 0x63e   :  { %v385_v61 = vpop.f32.mrf.mxu0 }
 0x63f   :  { %v391_v62 = vadd.f32 %v385_v61, %v138_v60 }
 0x640   :  { %v1746_v63 = vpop.f32.mrf.mxu0 }
 0x641   :  { %1903 = vtanh.f32 %v391_v62  ;;  %v1598_v9 = vmul.f32 -1.442695, %v391_v62 }
 0x642   :  { %v388_v1 = vpop.f32.mrf.mxu0 }
 0x643   :  { %1905 = vpow2.f32 %v1598_v9 }
 0x644   :  { %v1747_v3 = vpop.f32.mrf.mxu0 }
 0x64e   :  { %v1904_v4 = vpop.eup %1903 }
 0x64f   :  { %401 = vrot.lane.b32.xlu0 %v1904_v4, %s2060_s24 }
 0x650   :  { %v1906_v10 = vpop.eup %1905 }
 0x651   :  { %v395_v11 = vadd.f32 1.0, %v1906_v10 }
 0x653   :  { %1907 = vrcp.f32 %v395_v11  ;;  %v149_v11 = vadd.f32 %v2152_v8, %v2202_v59 }
 0x660   :  { %v1908_v12 = vpop.eup %1907 }
 0x661   :  { %v399_v7 = vmul.f32 %v1908_v12, %v328_v48 }
 0x6c1   :  { %v402_v13 = vpop.permute.xlu0 %401 }
 0x6c2   :  { %v404_v14 = vmul.f32 %v1908_v12, %v402_v13 }
 0x6c4   :  { %406 = vrot.lane.b32.xlu1 %v404_v14, %s2065_s2 }
 0x736   :  { %v407_v15 = vpop.permute.xlu1 %406 }
 0x737   :  { %v409_v16 = vadd.f32 %v407_v15, %v399_v7 }
 0x739   :  { %1909 = vtanh.f32 %v409_v16 }
 0x746   :  { %v1910_v17 = vpop.eup %1909 }
 0x747   :  { %412 = vrot.lane.b32.xlu0 %v1910_v17, %s2060_s24 }
 0x7b9   :  { %v413_v18 = vpop.permute.xlu0 %412 }
 0x7ba   :  { %v415_v19 = vmul.f32 %v1908_v12, %v413_v18 }
 0x7bc   :  { %v2209_v20 = vpack.c.bf16 %v415_v19, %v415_v19 }
 0x7be   :  { %427 = vrot.lane.b32.xlu1 %v2209_v20, %s2065_s2 }
 0x830   :  { %v428_v21 = vpop.permute.xlu1 %427 }
 0x831   :  { %1753 = vmatmul.mubr.msk.bf16.vlgmr.msra.gmra.mxu1 %vm185_vm2, %v428_v21 }
 0x832   :  { %1765 = vmatpush3.bf16.msra.mxu1 %v2116_v2  ;;  %1768 = vmatprep.mubr.msk.bf16.mxu1 %vm2063_vm0, %v2062_v0 }
 0x833   :  { %1766 = vmatprep.subr.bf16.mxu1 %v2062_v0 }
 0x836   :  { %1767 = vmatpush3.bf16.msra.mxu1 %v2130_v5 }
 0x837   :  { %1780 = vmatprep.subr.bf16.mxu1 %v2062_v0 }
 0x8f1   :  { %v466_v23 = vpop.f32.mrf.mxu1 }
 0x8f2   :  { %v472_v24 = vadd.f32 %v466_v23, %v141_v22 }
 0x8f3   :  { %v1754_v25 = vpop.f32.mrf.mxu1 }
 0x8f4   :  { %1911 = vtanh.f32 %v472_v24  ;;  %v1601_v30 = vmul.f32 -1.442695, %v472_v24 }
 0x8f5   :  { %v469_v26 = vpop.f32.mrf.mxu1 }
 0x8f6   :  { %1913 = vpow2.f32 %v1601_v30  ;;  %v154_v30 = vadd.f32 %v2196_v56, %v2152_v8 }
 0x8f7   :  { %v1755_v27 = vpop.f32.mrf.mxu1 }
 0x901   :  { %v1912_v28 = vpop.eup %1911 }
 0x902   :  { %482 = vrot.lane.b32.xlu0 %v1912_v28, %s2060_s24 }
 0x903   :  { %v1914_v32 = vpop.eup %1913 }
 0x904   :  { %v476_v33 = vadd.f32 1.0, %v1914_v32 }
 0x906   :  { %1915 = vrcp.f32 %v476_v33 }
 0x913   :  { %v1916_v34 = vpop.eup %1915 }
 0x914   :  { %v480_v31 = vmul.f32 %v1916_v34, %v409_v16 }
 0x974   :  { %v483_v35 = vpop.permute.xlu0 %482 }
 0x975   :  { %v485_v36 = vmul.f32 %v1916_v34, %v483_v35 }
 0x977   :  { %487 = vrot.lane.b32.xlu1 %v485_v36, %s2065_s2 }
 0x9e9   :  { %v488_v37 = vpop.permute.xlu1 %487 }
 0x9ea   :  { %v490_v38 = vadd.f32 %v488_v37, %v480_v31 }
 0x9ec   :  { %1917 = vtanh.f32 %v490_v38 }
 0x9f9   :  { %v1918_v39 = vpop.eup %1917 }
 0x9fa   :  { %493 = vrot.lane.b32.xlu0 %v1918_v39, %s2060_s24 }
 0xa6c   :  { %v494_v40 = vpop.permute.xlu0 %493 }
 0xa6d   :  { %v496_v41 = vmul.f32 %v1916_v34, %v494_v40 }
 0xa6f   :  { %v2225_v42 = vpack.c.bf16 %v496_v41, %v496_v41 }
 0xa71   :  { %508 = vrot.lane.b32.xlu1 %v2225_v42, %s2065_s2 }
 0xae3   :  { %v509_v43 = vpop.permute.xlu1 %508 }
 0xae4   :  { %1761 = vmatmul.mubr.msk.bf16.vlgmr.msra.gmra.mxu0 %vm185_vm2, %v509_v43 }
 0xae5   :  { %1773 = vmatpush3.bf16.msra.mxu0 %v2116_v2  ;;  %1776 = vmatprep.mubr.msk.bf16.mxu0 %vm2063_vm0, %v2062_v0 }
 0xae6   :  { %1774 = vmatprep.subr.bf16.mxu0 %v2062_v0 }
 0xae9   :  { %1775 = vmatpush3.bf16.msra.mxu0 %v2130_v5 }
 0xba4   :  { %v547_v45 = vpop.f32.mrf.mxu0 }
 0xba5   :  { %v553_v46 = vadd.f32 %v547_v45, %v146_v44 }
 0xba6   :  { %v1762_v47 = vpop.f32.mrf.mxu0 }
 0xba7   :  { %1919 = vtanh.f32 %v553_v46  ;;  %v1604_v51 = vmul.f32 -1.442695, %v553_v46 }
 0xba8   :  { %v550_v48 = vpop.f32.mrf.mxu0 }
 0xba9   :  { %1921 = vpow2.f32 %v1604_v51  ;;  %v1879_v48 = vld [vmem:[#allocation4 + $0x8] sm:$0xff]  }
 0xbaa   :  { %v1763_v49 = vpop.f32.mrf.mxu0  ;;  %1788 = vmatprep.subr.bf16.mxu0 %v1879_v48 }
 0xbab   :  { %v1880_v49 = vld [vmem:[#allocation4] sm:$0xff]  }
 0xbb4   :  { %v1920_v50 = vpop.eup %1919 }
 0xbb5   :  { %563 = vrot.lane.b32.xlu0 %v1920_v50, %s2060_s24 }
 0xbb6   :  { %v1922_v52 = vpop.eup %1921 }
 0xbb7   :  { %v557_v53 = vadd.f32 1.0, %v1922_v52 }
 0xbb9   :  { %1923 = vrcp.f32 %v557_v53 }
 0xbc6   :  { %v1924_v55 = vpop.eup %1923 }
 0xbc7   :  { %v561_v57 = vmul.f32 %v1924_v55, %v490_v38 }
 0xc27   :  { %v564_v60 = vpop.permute.xlu0 %563 }
 0xc28   :  { %v566_v61 = vmul.f32 %v1924_v55, %v564_v60  ;;  %v2298_v60 = vld [vmem:[%s2443_s4 + $0x10] sm:$0xff]  }
 0xc2a   :  { %568 = vrot.lane.b32.xlu1 %v566_v61, %s2065_s2 }
 0xc9c   :  { %v569_v62 = vpop.permute.xlu1 %568 }
 0xc9d   :  { %v571_v63 = vadd.f32 %v569_v62, %v561_v57  ;;  %v157_v57 = vadd.f32 %v2200_v58, %v2152_v8 }
 0xc9f   :  { %1925 = vtanh.f32 %v571_v63 }
 0xcac   :  { %v1926_v1 = vpop.eup %1925 }
 0xcad   :  { %574 = vrot.lane.b32.xlu0 %v1926_v1, %s2060_s24 }
 0xd1f   :  { %v575_v3 = vpop.permute.xlu0 %574 }
 0xd20   :  { %v577_v4 = vmul.f32 %v1924_v55, %v575_v3 }
 0xd22   :  { %v2240_v9 = vpack.c.bf16 %v577_v4, %v577_v4 }
 0xd24   :  { %589 = vrot.lane.b32.xlu1 %v2240_v9, %s2065_s2 }
 0xd96   :  { %v590_v10 = vpop.permute.xlu1 %589 }
 0xd97   :  { %1769 = vmatmul.mubr.msk.bf16.vlgmr.msra.gmra.mxu1 %vm185_vm2, %v590_v10  ;;  %v2323_v10 = vld [vmem:[%s2444_s5] ss:$0 sm:$0xff]  ;;  %s2066_s5 = smov [#allocation7]  }
 0xd98   :  { %1781 = vmatpush3.bf16.msra.mxu1 %v2116_v2  ;;  %1784 = vmatprep.mubr.msk.bf16.mxu1 %vm2063_vm0, %v2062_v0  ;;  %s1571_s22 = sshll.u32 %s2066_s5, 4  ;;  %s1572_s22 = int_to_ptr.vmem [resolvable:$true] %s1571_s22 }
 0xd99   :  { %1782 = vmatprep.subr.bf16.mxu1 %v2062_v0  ;;  %s2035_s23 = scalar_lea.vmem %s1572_s22, 128  ;;  %p2040_p6 = scmp.lt.s32.totalorder %s1572_s22, %s1572_s22 }
 0xd9a   :  { %p2036_p5 = scmp.ne.s32.totalorder %s1572_s22, %s2035_s23  ;;  %p2041_p7 = scmp.lt.s32.totalorder %s2035_s23, %s2035_s23 }
 0xd9c   :  { %1783 = vmatpush3.bf16.msra.mxu1 %v2130_v5  ;;  %p2042_p8 = por %p2041_p7, %p2040_p6 }
 0xd9d   :  { %1800 = vmatprep.subr.bf16.mxu1 %v2062_v0 }
 0xd9e   :  { %p2043_p9 = pnand %p2042_p8, %p2036_p5 }
 0xe57   :  { %v628_v12 = vpop.f32.mrf.mxu1 }
 0xe58   :  { %v634_v13 = vadd.f32 %v628_v12, %v149_v11 }
 0xe59   :  { %v1770_v14 = vpop.f32.mrf.mxu1 }
 0xe5a   :  { %1927 = vtanh.f32 %v634_v13  ;;  %v1607_v2 = vmul.f32 -1.442695, %v634_v13 }
 0xe5b   :  { %v631_v7 = vpop.f32.mrf.mxu1 }
 0xe5c   :  { %1929 = vpow2.f32 %v1607_v2 }
 0xe5d   :  { %v1771_v15 = vpop.f32.mrf.mxu1 }
 0xe67   :  { %v1928_v16 = vpop.eup %1927 }
 0xe68   :  { %644 = vrot.lane.b32.xlu0 %v1928_v16, %s2060_s24 }
 0xe69   :  { %v1930_v17 = vpop.eup %1929 }
 0xe6a   :  { %v638_v18 = vadd.f32 1.0, %v1930_v17 }
 0xe6c   :  { %1931 = vrcp.f32 %v638_v18 }
 0xe79   :  { %v1932_v5 = vpop.eup %1931 }
 0xe7a   :  { %v642_v59 = vmul.f32 %v1932_v5, %v571_v63 }
 0xeda   :  { %v645_v19 = vpop.permute.xlu0 %644 }
 0xedb   :  { %v647_v21 = vmul.f32 %v1932_v5, %v645_v19 }
 0xedd   :  { %649 = vrot.lane.b32.xlu1 %v647_v21, %s2065_s2 }
 0xf4f   :  { %v650_v22 = vpop.permute.xlu1 %649 }
 0xf50   :  { %v652_v23 = vadd.f32 %v650_v22, %v642_v59 }
 0xf52   :  { %1933 = vtanh.f32 %v652_v23 }
 0xf5f   :  { %v1934_v24 = vpop.eup %1933 }
 0xf60   :  { %655 = vrot.lane.b32.xlu0 %v1934_v24, %s2060_s24 }
 0xfd2   :  { %v656_v25 = vpop.permute.xlu0 %655 }
 0xfd3   :  { %v658_v26 = vmul.f32 %v1932_v5, %v656_v25 }
 0xfd5   :  { %v2256_v27 = vpack.c.bf16 %v658_v26, %v658_v26 }
 0xfd7   :  { %670 = vrot.lane.b32.xlu1 %v2256_v27, %s2065_s2 }
0x1049   :  { %v671_v28 = vpop.permute.xlu1 %670 }
0x104a   :  { %1777 = vmatmul.mubr.msk.bf16.vlgmr.msra.gmra.mxu0 %vm185_vm2, %v671_v28 }
0x104b   :  { %1789 = vmatpush3.bf16.msra.mxu0 %v1879_v48 }
0x104c   :  { %1790 = vmatprep.subr.bf16.mxu0 %v1880_v49 }
0x104f   :  { %1791 = vmatpush3.bf16.msra.mxu0 %v1880_v49 }
0x1050   :  { %1816 = vmatprep.subr.bf16.mxu0 %v2062_v0 }
0x110a   :  { %v709_v32 = vpop.f32.mrf.mxu0 }
0x110b   :  { %v715_v33 = vadd.f32 %v709_v32, %v154_v30 }
0x110c   :  { %v1778_v34 = vpop.f32.mrf.mxu0 }
0x110d   :  { %1935 = vtanh.f32 %v715_v33  ;;  %v1610_v37 = vmul.f32 -1.442695, %v715_v33 }
0x110e   :  { %v712_v35 = vpop.f32.mrf.mxu0 }
0x110f   :  { %1937 = vpow2.f32 %v1610_v37 }
0x1110   :  { %v1779_v36 = vpop.f32.mrf.mxu0 }
0x111a   :  { %v1936_v31 = vpop.eup %1935 }
0x111b   :  { %725 = vrot.lane.b32.xlu0 %v1936_v31, %s2060_s24 }
0x111c   :  { %v1938_v38 = vpop.eup %1937 }
0x111d   :  { %v719_v39 = vadd.f32 1.0, %v1938_v38 }
0x111f   :  { %1939 = vrcp.f32 %v719_v39 }
0x112c   :  { %v1940_v40 = vpop.eup %1939 }
0x112d   :  { %v723_v56 = vmul.f32 %v1940_v40, %v652_v23 }
0x118d   :  { %v726_v41 = vpop.permute.xlu0 %725 }
0x118e   :  { %v728_v43 = vmul.f32 %v1940_v40, %v726_v41 }
0x1190   :  { %730 = vrot.lane.b32.xlu1 %v728_v43, %s2065_s2 }
0x1194   :  { %258 = vrot.lane.b32.xlu1 %v2158_v29, %s2065_s2 }
0x1198   :  { %420 = vrot.lane.b32.xlu1 %v2209_v20, %s2065_s2 }
0x1202   :  { %v731_v44 = vpop.permute.xlu1 %730 }
0x1203   :  { %v2269_v45 = vadd.f32 %v731_v44, %v723_v56 }
0x1205   :  { %1941 = vtanh.f32 %v2269_v45 }
0x1206   :  { %v259_v46 = vpop.permute.xlu1 %258 }
0x1207   :  { %262 = vst.msk [vmem:[#allocation3] sm:$0xf] %vm261_vm3, %v259_v46 }
0x120a   :  { %v421_v47 = vpop.permute.xlu1 %420 }
0x120b   :  { %424 = vst.msk [vmem:[#allocation3 + $0x8] sm:$0xf] %vm261_vm3, %v421_v47 }
0x1212   :  { %v1942_v29 = vpop.eup %1941 }
0x1213   :  { %736 = vrot.lane.b32.xlu0 %v1942_v29, %s2060_s24 }
0x1217   :  { %339 = vrot.lane.b32.xlu0 %v2185_v54, %s2065_s2 }
0x121b   :  { %501 = vrot.lane.b32.xlu0 %v2225_v42, %s2065_s2  ;;  %v2290_v42 = vld [vmem:[%s2443_s4 + $0x18] sm:$0xff]  }
0x1285   :  { %v737_v20 = vpop.permute.xlu0 %736 }
0x1286   :  { %v739_v50 = vmul.f32 %v1940_v40, %v737_v20 }
0x1288   :  { %v2280_v51 = vpack.c.bf16 %v739_v50, %v739_v50 }
0x1289   :  { %v340_v52 = vpop.permute.xlu0 %339 }
0x128a   :  { %343 = vst.msk [vmem:[#allocation3 + $0x4] sm:$0xf] %vm261_vm3, %v340_v52  ;;  %751 = vrot.lane.b32.xlu1 %v2280_v51, %s2065_s2 }
0x128d   :  { %v502_v53 = vpop.permute.xlu0 %501 }
0x128e   :  { %505 = vst.msk [vmem:[#allocation3 + $0xc] sm:$0xf] %vm261_vm3, %v502_v53 }
0x1291   :  { %v1881_v55 = vld [vmem:[#allocation3] sm:$0xff]  }
0x1292   :  { %1792 = vmatprep.mubr.msk.bf16.mxu0 %vm185_vm2, %v1881_v55 }
0x1295   :  { %v1882_v54 = vld [vmem:[#allocation3 + $0x8] sm:$0xff]  }
0x1296   :  { %1793 = vmatmul.mubr.msk.bf16.vlgmr.msra.gmra.mxu0 %vm185_vm2, %v1882_v54 }
0x1297   :  { %1817 = vmatpush3.bf16.msra.mxu0 %v2290_v42 }
0x1298   :  { %1818 = vmatprep.subr.bf16.mxu0 %v2062_v0 }
0x129b   :  { %1819 = vmatpush3.bf16.msra.mxu0 %v2298_v60 }
0x129c   :  { %1832 = vmatprep.subr.bf16.mxu0 %v2062_v0 }
0x12fc   :  { %v752_v61 = vpop.permute.xlu1 %751 }
0x12fd   :  { %1785 = vmatmul.mubr.msk.bf16.vlgmr.msra.gmra.mxu1 %vm185_vm2, %v752_v61 }
0x12fe   :  { %1801 = vmatpush3.bf16.msra.mxu1 %v2290_v42  ;;  %1804 = vmatprep.mubr.msk.bf16.mxu1 %vm2063_vm0, %v2062_v0 }
0x12ff   :  { %1802 = vmatprep.subr.bf16.mxu1 %v2062_v0 }
0x1302   :  { %1803 = vmatpush3.bf16.msra.mxu1 %v2298_v60 }
0x1303   :  { %1808 = vmatprep.subr.bf16.mxu1 %v2062_v0 }
0x1305   :  { %1805 = vmatmul.mubr.bf16.vlgmr.msra.gmra.mxu1 %v2064_v6 }
0x1306   :  { %1809 = vmatpush3.bf16.msra.mxu1 %v2290_v42  ;;  %1812 = vmatprep.mubr.msk.bf16.mxu1 %vm2063_vm0, %v2062_v0 }
0x1307   :  { %1810 = vmatprep.subr.bf16.mxu1 %v2062_v0 }
0x130a   :  { %1811 = vmatpush3.bf16.msra.mxu1 %v2298_v60 }
0x130b   :  { %1824 = vmatprep.subr.bf16.mxu1 %v2062_v0 }
0x1356   :  { %v2318_v62 = vpop.f32.mrf.mxu0 }
0x1358   :  { %v927_v6 = vpop.f32.mrf.mxu0 }
0x1359   :  { %v928_v12 = vadd.f32 %v2323_v10, %v927_v6 }
0x135a   :  { %v2347_v44 = vpop.f32.mrf.mxu0 }
0x13bd   :  { %v790_v63 = vpop.f32.mrf.mxu1 }
0x13be   :  { %v796_v1 = vadd.f32 %v790_v63, %v157_v57 }
0x13bf   :  { %v1786_v3 = vpop.f32.mrf.mxu1 }
0x13c0   :  { %v1613_v25 = vmul.f32 -1.442695, %v796_v1 }
0x13c1   :  { %v793_v4 = vpop.f32.mrf.mxu1 }
0x13c3   :  { %v1787_v11 = vpop.f32.mrf.mxu1 }
0x13c5   :  { %v1018_v13 = vpop.f32.mrf.mxu1 }
0x13c6   :  { %v1024_v14 = vadd.f32 %v1018_v13, %v928_v12 }
0x13c7   :  { %v1806_v7 = vpop.f32.mrf.mxu1 }
0x13c8   :  { %1943 = vtanh.f32 %v1024_v14  ;;  %v1632_v16 = vmul.f32 -1.442695, %v1024_v14 }
0x13c9   :  { %v1021_v8 = vpop.f32.mrf.mxu1 }
0x13ca   :  { %1945 = vpow2.f32 %v1632_v16 }
0x13cb   :  { %v1807_v58 = vpop.f32.mrf.mxu1 }
0x13d5   :  { %v1944_v15 = vpop.eup %1943 }
0x13d6   :  { %1034 = vrot.lane.b32.xlu0 %v1944_v15, %s2060_s24 }
0x13d7   :  { %v1946_v2 = vpop.eup %1945 }
0x13d8   :  { %v1028_v17 = vadd.f32 1.0, %v1946_v2 }
0x13da   :  { %1947 = vrcp.f32 %v1028_v17  ;;  %v936_v17 = vadd.f32 %v2318_v62, %v2323_v10 }
0x13e7   :  { %v1948_v18 = vpop.eup %1947 }
0x13e8   :  { %v1032_v21 = vmul.f32 0.0, %v1948_v18 }
0x1448   :  { %v1035_v5 = vpop.permute.xlu0 %1034 }
0x1449   :  { %v1037_v19 = vmul.f32 %v1948_v18, %v1035_v5 }
0x144b   :  { %1039 = vrot.lane.b32.xlu1 %v1037_v19, %s2065_s2 }
0x14bd   :  { %v1040_v59 = vpop.permute.xlu1 %1039 }
0x14be   :  { %v1042_v22 = vadd.f32 %v1040_v59, %v1032_v21 }
0x14c0   :  { %1949 = vtanh.f32 %v1042_v22 }
0x14c1   :  { %1951 = vtanh.f32 %v796_v1 }
0x14c2   :  { %1953 = vpow2.f32 %v1613_v25 }
0x14cd   :  { %v1950_v23 = vpop.eup %1949 }
0x14ce   :  { %1045 = vrot.lane.b32.xlu0 %v1950_v23, %s2060_s24  ;;  %v1952_v24 = vpop.eup %1951 }
0x14cf   :  { %v1954_v26 = vpop.eup %1953 }
0x14d0   :  { %v800_v28 = vadd.f32 1.0, %v1954_v26 }
0x14d2   :  { %806 = vrot.lane.b32.xlu0 %v1952_v24, %s2060_s24  ;;  %1955 = vrcp.f32 %v800_v28 }
0x14df   :  { %v1956_v34 = vpop.eup %1955 }
0x14e0   :  { %v804_v37 = vmul.f32 %v1956_v34, %v2269_v45  ;;  %v930_v45 = vpop.f32.mrf.mxu0 }
0x14e1   :  { %v931_v46 = vadd.f32 %v2323_v10, %v930_v45 }
0x1540   :  { %v1046_v30 = vpop.permute.xlu0 %1045 }
0x1541   :  { %v1048_v32 = vmul.f32 %v1948_v18, %v1046_v30 }
0x1543   :  { %v1049_v33 = vpack.c.bf16 %v1048_v32, %v1048_v32 }
0x1544   :  { %v807_v35 = vpop.permute.xlu0 %806 }
0x1545   :  { %v809_v36 = vmul.f32 %v1956_v34, %v807_v35  ;;  %1052 = vrot.lane.b32.xlu1 %v1049_v33, %s2065_s2 }
0x1547   :  { %811 = vrot.lane.b32.xlu0 %v809_v36, %s2065_s2 }
0x15b7   :  { %v1053_v31 = vpop.permute.xlu1 %1052 }
0x15b8   :  { %1813 = vmatmul.mubr.msk.bf16.vlgmr.msra.gmra.mxu1 %vm185_vm2, %v1053_v31 }
0x15b9   :  { %v812_v38 = vpop.permute.xlu0 %811  ;;  %1825 = vmatpush3.bf16.msra.mxu1 %v2290_v42  ;;  %1828 = vmatprep.mubr.msk.bf16.mxu1 %vm2063_vm0, %v2062_v0 }
0x15ba   :  { %v814_v39 = vadd.f32 %v812_v38, %v804_v37  ;;  %1826 = vmatprep.subr.bf16.mxu1 %v2062_v0  ;;  %v939_v38 = vadd.f32 %v2347_v44, %v2323_v10 }
0x15bc   :  { %1957 = vtanh.f32 %v814_v39 }
0x15bd   :  { %1827 = vmatpush3.bf16.msra.mxu1 %v2298_v60 }
0x15be   :  { %1840 = vmatprep.subr.bf16.mxu1 %v2062_v0 }
0x15c9   :  { %v1958_v40 = vpop.eup %1957 }
0x15ca   :  { %817 = vrot.lane.b32.xlu0 %v1958_v40, %s2060_s24 }
0x15ce   :  { %582 = vrot.lane.b32.xlu0 %v2240_v9, %s2065_s2 }
0x15d2   :  { %744 = vrot.lane.b32.xlu0 %v2280_v51, %s2065_s2 }
0x163c   :  { %v818_v41 = vpop.permute.xlu0 %817 }
0x163d   :  { %v820_v3 = vmul.f32 %v1956_v34, %v818_v41 }
0x163f   :  { %v1654_v6 = vpack.c.bf16 %v820_v3, %v820_v3 }
0x1640   :  { %v583_v43 = vpop.permute.xlu0 %582 }
0x1641   :  { %586 = vst.msk [vmem:[#allocation3 + $0x10] sm:$0xf] %vm261_vm3, %v583_v43 }
0x1644   :  { %v745_v56 = vpop.permute.xlu0 %744 }
0x1645   :  { %748 = vst.msk [vmem:[#allocation3 + $0x18] sm:$0xf] %vm261_vm3, %v745_v56 }
0x1678   :  { %v1091_v47 = vpop.f32.mrf.mxu1 }
0x1679   :  { %v1097_v48 = vadd.f32 %v1091_v47, %v931_v46 }
0x167a   :  { %v1814_v49 = vpop.f32.mrf.mxu1 }
0x167b   :  { %1959 = vtanh.f32 %v1097_v48  ;;  %v1634_v50 = vmul.f32 -1.442695, %v1097_v48 }
0x167c   :  { %v1094_v9 = vpop.f32.mrf.mxu1 }
0x167d   :  { %1961 = vpow2.f32 %v1634_v50 }
0x167e   :  { %v1815_v29 = vpop.f32.mrf.mxu1 }
0x1688   :  { %v1960_v20 = vpop.eup %1959 }
0x1689   :  { %1107 = vrot.lane.b32.xlu1 %v1960_v20, %s2060_s24 }
0x168a   :  { %v1962_v51 = vpop.eup %1961 }
0x168b   :  { %v1101_v52 = vadd.f32 1.0, %v1962_v51 }
0x168d   :  { %1963 = vrcp.f32 %v1101_v52 }
0x169a   :  { %v1964_v53 = vpop.eup %1963 }
0x169b   :  { %v1105_v61 = vmul.f32 %v1964_v53, %v1042_v22 }
0x16fb   :  { %v1108_v55 = vpop.permute.xlu1 %1107 }
0x16fc   :  { %v1110_v54 = vmul.f32 %v1964_v53, %v1108_v55 }
0x16fe   :  { %1112 = vrot.lane.b32.xlu1 %v1110_v54, %s2065_s2 }
0x1770   :  { %v1113_v57 = vpop.permute.xlu1 %1112 }
0x1771   :  { %v1115_v63 = vadd.f32 %v1113_v57, %v1105_v61 }
0x1773   :  { %1965 = vtanh.f32 %v1115_v63 }
0x1780   :  { %v1966_v1 = vpop.eup %1965 }
0x1781   :  { %1118 = vrot.lane.b32.xlu1 %v1966_v1, %s2060_s24 }
0x1785   :  { %663 = vrot.lane.b32.xlu1 %v2256_v27, %s2065_s2 }
0x1789   :  { %825 = vrot.lane.b32.xlu1 %v1654_v6, %s2065_s2 }
0x17f3   :  { %v1119_v4 = vpop.permute.xlu1 %1118 }
0x17f4   :  { %v1121_v11 = vmul.f32 %v1964_v53, %v1119_v4 }
0x17f6   :  { %v1122_v12 = vpack.c.bf16 %v1121_v11, %v1121_v11 }
0x17f7   :  { %v664_v13 = vpop.permute.xlu1 %663 }
0x17f8   :  { %667 = vst.msk [vmem:[#allocation3 + $0x14] sm:$0xf] %vm261_vm3, %v664_v13  ;;  %1125 = vrot.lane.b32.xlu0 %v1122_v12, %s2065_s2 }
0x17fb   :  { %v826_v14 = vpop.permute.xlu1 %825 }
0x17fc   :  { %829 = vst.msk [vmem:[#allocation3 + $0x1c] sm:$0xf] %vm261_vm3, %v826_v14 }
0x17ff   :  { %v1885_v7 = vld [vmem:[#allocation3 + $0x10] sm:$0xff]  }
0x1800   :  { %1796 = vmatprep.mubr.msk.bf16.mxu0 %vm185_vm2, %v1885_v7 }
0x1803   :  { %v1886_v8 = vld [vmem:[#allocation3 + $0x18] sm:$0xff]  }
0x1804   :  { %1797 = vmatmul.mubr.msk.bf16.gmra.mxu0 %vm185_vm2, %v1886_v8 }
0x1805   :  { %1820 = vmatprep.mubr.msk.bf16.mxu0 %vm2063_vm0, %v2062_v0 }
0x186a   :  { %v1126_v27 = vpop.permute.xlu0 %1125 }
0x186b   :  { %1821 = vmatmul.mubr.msk.bf16.vlgmr.msra.gmra.mxu0 %vm185_vm2, %v1126_v27 }
0x186c   :  { %1833 = vmatpush3.bf16.msra.mxu0 %v2290_v42  ;;  %1836 = vmatprep.mubr.msk.bf16.mxu0 %vm2063_vm0, %v2062_v0 }
0x186d   :  { %1834 = vmatprep.subr.bf16.mxu0 %v2062_v0 }
0x1870   :  { %1835 = vmatpush3.bf16.msra.mxu0 %v2298_v60 }
0x1871   :  { %1848 = vmatprep.subr.bf16.mxu0 %v2062_v0 }
0x18c4   :  { %v2370_v58 = vpop.f32.mrf.mxu0 }
0x18c6   :  { %v2372_v15 = vpop.f32.mrf.mxu0 }
0x18c7   :  { %v944_v61 = vadd.f32 %v2323_v10, %v2372_v15 }
0x18c8   :  { %v2374_v16 = vpop.f32.mrf.mxu0 }
0x18ca   :  { %v2376_v2 = vpop.f32.mrf.mxu0 }
0x192b   :  { %v1164_v18 = vpop.f32.mrf.mxu0 }
0x192c   :  { %v1170_v5 = vadd.f32 %v1164_v18, %v936_v17 }
0x192d   :  { %v1822_v19 = vpop.f32.mrf.mxu0 }
0x192e   :  { %1967 = vtanh.f32 %v1170_v5  ;;  %v1636_v23 = vmul.f32 -1.442695, %v1170_v5 }
0x192f   :  { %v1167_v21 = vpop.f32.mrf.mxu0 }
0x1930   :  { %1969 = vpow2.f32 %v1636_v23 }
0x1931   :  { %v1823_v59 = vpop.f32.mrf.mxu0 }
0x193b   :  { %v1968_v22 = vpop.eup %1967 }
0x193c   :  { %1180 = vrot.lane.b32.xlu1 %v1968_v22, %s2060_s24  ;;  %v947_v22 = vadd.f32 %v2323_v10, %v2376_v2 }
0x193d   :  { %v1970_v24 = vpop.eup %1969 }
0x193e   :  { %v1174_v25 = vadd.f32 1.0, %v1970_v24 }
0x1940   :  { %1971 = vrcp.f32 %v1174_v25 }
0x194d   :  { %v1972_v26 = vpop.eup %1971 }
0x194e   :  { %v1178_v62 = vmul.f32 %v1972_v26, %v1115_v63 }
0x19ae   :  { %v1181_v28 = vpop.permute.xlu1 %1180 }
0x19af   :  { %v1183_v30 = vmul.f32 %v1972_v26, %v1181_v28 }
0x19b1   :  { %1185 = vrot.lane.b32.xlu0 %v1183_v30, %s2065_s2 }
0x1a23   :  { %v1186_v32 = vpop.permute.xlu0 %1185 }
0x1a24   :  { %v1188_v33 = vadd.f32 %v1186_v32, %v1178_v62 }
0x1a26   :  { %1973 = vtanh.f32 %v1188_v33 }
0x1a33   :  { %v1974_v34 = vpop.eup %1973 }
0x1a34   :  { %1191 = vrot.lane.b32.xlu1 %v1974_v34, %s2060_s24 }
0x1aa6   :  { %v1192_v35 = vpop.permute.xlu1 %1191 }
0x1aa7   :  { %v1194_v36 = vmul.f32 %v1972_v26, %v1192_v35 }
0x1aa9   :  { %v1195_v31 = vpack.c.bf16 %v1194_v36, %v1194_v36 }
0x1aab   :  { %1198 = vrot.lane.b32.xlu0 %v1195_v31, %s2065_s2 }
0x1b1d   :  { %v1199_v37 = vpop.permute.xlu0 %1198 }
0x1b1e   :  { %1829 = vmatmul.mubr.msk.bf16.vlgmr.msra.gmra.mxu1 %vm185_vm2, %v1199_v37 }
0x1b1f   :  { %1841 = vmatpush3.bf16.msra.mxu1 %v2290_v42  ;;  %1844 = vmatprep.mubr.msk.bf16.mxu1 %vm2063_vm0, %v2062_v0 }
0x1b20   :  { %1842 = vmatprep.subr.bf16.mxu1 %v2062_v0 }
0x1b23   :  { %1843 = vmatpush3.bf16.msra.mxu1 %v2298_v60 }
0x1b24   :  { %1856 = vmatprep.subr.bf16.mxu1 %v2062_v0 }
0x1bde   :  { %v1237_v39 = vpop.f32.mrf.mxu1 }
0x1bdf   :  { %v1243_v40 = vadd.f32 %v1237_v39, %v939_v38 }
0x1be0   :  { %v1830_v41 = vpop.f32.mrf.mxu1 }
0x1be1   :  { %1975 = vtanh.f32 %v1243_v40  ;;  %v1638_v46 = vmul.f32 -1.442695, %v1243_v40  ;;  %v952_v40 = vadd.f32 %v2370_v58, %v2323_v10 }
0x1be2   :  { %v1240_v43 = vpop.f32.mrf.mxu1 }
0x1be3   :  { %1977 = vpow2.f32 %v1638_v46 }
0x1be4   :  { %v1831_v56 = vpop.f32.mrf.mxu1 }
0x1bee   :  { %v1976_v45 = vpop.eup %1975 }
0x1bef   :  { %1253 = vrot.lane.b32.xlu1 %v1976_v45, %s2060_s24 }
0x1bf0   :  { %v1978_v47 = vpop.eup %1977 }
0x1bf1   :  { %v1247_v48 = vadd.f32 1.0, %v1978_v47 }
0x1bf3   :  { %1979 = vrcp.f32 %v1247_v48 }
0x1c00   :  { %v1980_v49 = vpop.eup %1979 }
0x1c01   :  { %v1251_v44 = vmul.f32 %v1980_v49, %v1188_v33 }
0x1c61   :  { %v1254_v9 = vpop.permute.xlu1 %1253 }
0x1c62   :  { %v1256_v29 = vmul.f32 %v1980_v49, %v1254_v9 }
0x1c64   :  { %1258 = vrot.lane.b32.xlu0 %v1256_v29, %s2065_s2 }
0x1cd6   :  { %v1259_v20 = vpop.permute.xlu0 %1258 }
0x1cd7   :  { %v1261_v50 = vadd.f32 %v1259_v20, %v1251_v44 }
0x1cd9   :  { %1981 = vtanh.f32 %v1261_v50 }
0x1ce6   :  { %v1982_v51 = vpop.eup %1981 }
0x1ce7   :  { %1264 = vrot.lane.b32.xlu1 %v1982_v51, %s2060_s24 }
0x1d59   :  { %v1265_v52 = vpop.permute.xlu1 %1264 }
0x1d5a   :  { %v1267_v53 = vmul.f32 %v1980_v49, %v1265_v52 }
0x1d5c   :  { %v1268_v55 = vpack.c.bf16 %v1267_v53, %v1267_v53 }
0x1d5e   :  { %1271 = vrot.lane.b32.xlu0 %v1268_v55, %s2065_s2 }
0x1dd0   :  { %v1272_v54 = vpop.permute.xlu0 %1271 }
0x1dd1   :  { %1837 = vmatmul.mubr.msk.bf16.vlgmr.msra.gmra.mxu0 %vm185_vm2, %v1272_v54 }
0x1dd2   :  { %1849 = vmatpush3.bf16.msra.mxu0 %v2290_v42  ;;  %1852 = vmatprep.mubr.msk.bf16.mxu0 %vm2063_vm0, %v2062_v0 }
0x1dd3   :  { %1850 = vmatprep.subr.bf16.mxu0 %v2062_v0 }
0x1dd6   :  { %1851 = vmatpush3.bf16.msra.mxu0 %v2298_v60 }
0x1e91   :  { %v1310_v57 = vpop.f32.mrf.mxu0 }
0x1e92   :  { %v1316_v63 = vadd.f32 %v1310_v57, %v944_v61  ;;  %v955_v57 = vadd.f32 %v2374_v16, %v2323_v10 }
0x1e93   :  { %v1838_v1 = vpop.f32.mrf.mxu0 }
0x1e94   :  { %1983 = vtanh.f32 %v1316_v63  ;;  %v1640_v11 = vmul.f32 -1.442695, %v1316_v63 }
0x1e95   :  { %v1313_v3 = vpop.f32.mrf.mxu0 }
0x1e96   :  { %1985 = vpow2.f32 %v1640_v11 }
0x1e97   :  { %v1839_v6 = vpop.f32.mrf.mxu0 }
0x1ea1   :  { %v1984_v4 = vpop.eup %1983 }
0x1ea2   :  { %1326 = vrot.lane.b32.xlu1 %v1984_v4, %s2060_s24 }
0x1ea3   :  { %v1986_v12 = vpop.eup %1985 }
0x1ea4   :  { %v1320_v13 = vadd.f32 1.0, %v1986_v12 }
0x1ea6   :  { %1987 = vrcp.f32 %v1320_v13 }
0x1eb3   :  { %v1988_v14 = vpop.eup %1987 }
0x1eb4   :  { %v1324_v27 = vmul.f32 %v1988_v14, %v1261_v50 }
0x1f14   :  { %v1327_v7 = vpop.permute.xlu1 %1326 }
0x1f15   :  { %v1329_v8 = vmul.f32 %v1988_v14, %v1327_v7 }
0x1f17   :  { %1331 = vrot.lane.b32.xlu0 %v1329_v8, %s2065_s2 }
0x1f89   :  { %v1332_v15 = vpop.permute.xlu0 %1331 }
0x1f8a   :  { %v1334_v17 = vadd.f32 %v1332_v15, %v1324_v27 }
0x1f8c   :  { %1989 = vtanh.f32 %v1334_v17 }
0x1f99   :  { %v1990_v18 = vpop.eup %1989 }
0x1f9a   :  { %1337 = vrot.lane.b32.xlu1 %v1990_v18, %s2060_s24 }
0x200c   :  { %v1338_v5 = vpop.permute.xlu1 %1337 }
0x200d   :  { %v1340_v19 = vmul.f32 %v1988_v14, %v1338_v5 }
0x200f   :  { %v1341_v21 = vpack.c.bf16 %v1340_v19, %v1340_v19 }
0x2011   :  { %1344 = vrot.lane.b32.xlu0 %v1341_v21, %s2065_s2 }
0x2083   :  { %v1345_v59 = vpop.permute.xlu0 %1344 }
0x2084   :  { %1845 = vmatmul.mubr.msk.bf16.vlgmr.msra.gmra.mxu1 %vm185_vm2, %v1345_v59 }
0x2085   :  { %1857 = vmatpush3.bf16.msra.mxu1 %v2290_v42  ;;  %1860 = vmatprep.mubr.msk.bf16.mxu1 %vm2063_vm0, %v2062_v0 }
0x2086   :  { %1858 = vmatprep.subr.bf16.mxu1 %v2062_v0 }
0x2089   :  { %1859 = vmatpush3.bf16.msra.mxu1 %v2298_v60 }
0x2144   :  { %v1383_v23 = vpop.f32.mrf.mxu1 }
0x2145   :  { %v1389_v24 = vadd.f32 %v1383_v23, %v947_v22 }
0x2146   :  { %v1846_v25 = vpop.f32.mrf.mxu1 }
0x2147   :  { %1991 = vtanh.f32 %v1389_v24  ;;  %v1642_v42 = vmul.f32 -1.442695, %v1389_v24 }
0x2148   :  { %v1386_v26 = vpop.f32.mrf.mxu1 }
0x2149   :  { %1993 = vpow2.f32 %v1642_v42 }
0x214a   :  { %v1847_v28 = vpop.f32.mrf.mxu1 }
0x2154   :  { %v1992_v30 = vpop.eup %1991 }
0x2155   :  { %1399 = vrot.lane.b32.xlu1 %v1992_v30, %s2060_s24 }
0x2156   :  { %v1994_v62 = vpop.eup %1993 }
0x2157   :  { %v1393_v32 = vadd.f32 1.0, %v1994_v62 }
0x2159   :  { %1995 = vrcp.f32 %v1393_v32 }
0x2166   :  { %v1996_v0 = vpop.eup %1995 }
0x2167   :  { %v1397_v2 = vmul.f32 %v1996_v0, %v1334_v17 }
0x21c7   :  { %v1400_v33 = vpop.permute.xlu1 %1399 }
0x21c8   :  { %v1402_v60 = vmul.f32 %v1996_v0, %v1400_v33 }
0x21ca   :  { %1404 = vrot.lane.b32.xlu0 %v1402_v60, %s2065_s2 }
0x223c   :  { %v1405_v34 = vpop.permute.xlu0 %1404 }
0x223d   :  { %v1407_v35 = vadd.f32 %v1405_v34, %v1397_v2 }
0x223f   :  { %1997 = vtanh.f32 %v1407_v35 }
0x224c   :  { %v1998_v36 = vpop.eup %1997 }
0x224d   :  { %1410 = vrot.lane.b32.xlu1 %v1998_v36, %s2060_s24 }
0x22bf   :  { %v1411_v31 = vpop.permute.xlu1 %1410 }
0x22c0   :  { %v1413_v37 = vmul.f32 %v1996_v0, %v1411_v31 }
0x22c2   :  { %v1414_v38 = vpack.c.bf16 %v1413_v37, %v1413_v37 }
0x22c4   :  { %1417 = vrot.lane.b32.xlu0 %v1414_v38, %s2065_s2 }
0x2336   :  { %v1418_v39 = vpop.permute.xlu0 %1417 }
0x2337   :  { %1853 = vmatmul.mubr.msk.bf16.vlgmr.msra.gmra.mxu0 %vm185_vm2, %v1418_v39 }
0x23f7   :  { %v1456_v41 = vpop.f32.mrf.mxu0 }
0x23f8   :  { %v1462_v43 = vadd.f32 %v1456_v41, %v952_v40 }
0x23f9   :  { %v1854_v56 = vpop.f32.mrf.mxu0 }
0x23fa   :  { %1999 = vtanh.f32 %v1462_v43  ;;  %v1644_v48 = vmul.f32 -1.442695, %v1462_v43 }
0x23fb   :  { %v1459_v45 = vpop.f32.mrf.mxu0 }
0x23fc   :  { %2001 = vpow2.f32 %v1644_v48 }
0x23fd   :  { %v1855_v46 = vpop.f32.mrf.mxu0 }
0x2407   :  { %v2000_v47 = vpop.eup %1999 }
0x2408   :  { %1472 = vrot.lane.b32.xlu1 %v2000_v47, %s2060_s24 }
0x2409   :  { %v2002_v49 = vpop.eup %2001 }
0x240a   :  { %v1466_v9 = vadd.f32 1.0, %v2002_v49 }
0x240c   :  { %2003 = vrcp.f32 %v1466_v9 }
0x2419   :  { %v2004_v29 = vpop.eup %2003 }
0x241a   :  { %v1470_v58 = vmul.f32 %v2004_v29, %v1407_v35 }
0x247a   :  { %v1473_v44 = vpop.permute.xlu1 %1472 }
0x247b   :  { %v1475_v20 = vmul.f32 %v2004_v29, %v1473_v44 }
0x247d   :  { %1477 = vrot.lane.b32.xlu0 %v1475_v20, %s2065_s2 }
0x24ef   :  { %v1478_v50 = vpop.permute.xlu0 %1477 }
0x24f0   :  { %v1480_v51 = vadd.f32 %v1478_v50, %v1470_v58 }
0x24f2   :  { %2005 = vtanh.f32 %v1480_v51 }
0x24ff   :  { %v2006_v52 = vpop.eup %2005 }
0x2500   :  { %1483 = vrot.lane.b32.xlu1 %v2006_v52, %s2060_s24 }
0x2572   :  { %v1484_v53 = vpop.permute.xlu1 %1483 }
0x2573   :  { %v1486_v55 = vmul.f32 %v2004_v29, %v1484_v53 }
0x2575   :  { %v1487_v54 = vpack.c.bf16 %v1486_v55, %v1486_v55 }
0x2577   :  { %1490 = vrot.lane.b32.xlu0 %v1487_v54, %s2065_s2 }
0x25e9   :  { %v1491_v61 = vpop.permute.xlu0 %1490 }
0x25ea   :  { %1861 = vmatmul.mubr.msk.bf16.vlgmr.msra.gmra.mxu1 %vm185_vm2, %v1491_v61 }
0x26aa   :  { %v1529_v63 = vpop.f32.mrf.mxu1 }
0x26ab   :  { %v1535_v1 = vadd.f32 %v1529_v63, %v955_v57 }
0x26ac   :  { %v1862_v3 = vpop.f32.mrf.mxu1 }
0x26ad   :  { %2007 = vtanh.f32 %v1535_v1  ;;  %v1646_v12 = vmul.f32 -1.442695, %v1535_v1 }
0x26ae   :  { %v1532_v6 = vpop.f32.mrf.mxu1 }
0x26af   :  { %2009 = vpow2.f32 %v1646_v12 }
0x26b0   :  { %v1863_v4 = vpop.f32.mrf.mxu1 }
0x26ba   :  { %v2008_v11 = vpop.eup %2007 }
0x26bb   :  { %1545 = vrot.lane.b32.xlu1 %v2008_v11, %s2060_s24 }
0x26bc   :  { %v2010_v13 = vpop.eup %2009 }
0x26bd   :  { %v1539_v14 = vadd.f32 1.0, %v2010_v13 }
0x26bf   :  { %2011 = vrcp.f32 %v1539_v14 }
0x26cc   :  { %v2012_v7 = vpop.eup %2011 }
0x26cd   :  { %v1543_v10 = vmul.f32 %v2012_v7, %v1480_v51 }
0x272d   :  { %v1546_v8 = vpop.permute.xlu1 %1545 }
0x272e   :  { %v1548_v27 = vmul.f32 %v2012_v7, %v1546_v8 }
0x2730   :  { %1550 = vrot.lane.b32.xlu0 %v1548_v27, %s2065_s2 }
0x27a2   :  { %v1551_v16 = vpop.permute.xlu0 %1550 }
0x27a3   :  { %v1553_v15 = vadd.f32 %v1551_v16, %v1543_v10 }
0x27a5   :  { %2013 = vtanh.f32 %v1553_v15 }
0x27b2   :  { %v2014_v17 = vpop.eup %2013 }
0x27b3   :  { %1556 = vrot.lane.b32.xlu1 %v2014_v17, %s2060_s24 }
0x2825   :  { %v1557_v18 = vpop.permute.xlu1 %1556 }
0x2826   :  { %v1559_v5 = vmul.f32 %v2012_v7, %v1557_v18 }
0x2828   :  { %1561 = vrot.lane.b32.xlu0 %v1559_v5, %s2065_s2 }
0x289a   :  { %v1562_v19 = vpop.permute.xlu0 %1561 }
0x289b   :  { %1564 = vst.msk [vmem:[#allocation7] sm:$0xff] %vm185_vm2, %v1562_v19 }
0x289c   :  { %2046 = shalt.err (!%p2043_p9)
}
0x289d   :  { %1574 = dma.vmem_to_hbm [thread:$0]  %s1572_s22, 128, %s2445_s6, [#allocation6]  }
0x289e   :  { %2057 = dma.done.wait [#allocation6], 128  }
0x289f   :  { %2058 = vsyncadd [#allocation6], 4294967168 }
0x28a0   :  { %1578 = vsyncpa [#allocation5], 1 }
0x28a1   :  { %1579 = vsyncpa [#allocation6], 1 }

</bundles_post_ra>
